<compile_context>
chip_gen: v7x
topology: tpu7x:2x2x1
jax: 0.10.0
libtpu: 0.0.40
codegen_flags: <defaults>
</compile_context>

<pallas_src>
import functools

import jax
import jax.numpy as jnp
import numpy as np
from jax.experimental import pallas as pl
from jax.experimental.pallas import tpu as pltpu

EPS = 1e-5               # BatchNorm1d default eps
NEG_SLOPE = 0.2          # LeakyReLU negative slope
VMEM_LIMIT = 32 * 1024 * 1024
TILE_TARGET_BYTES = 1 * 1024 * 1024   # target f32 bytes per x tile


def _leaky_relu(h):
    return jnp.where(h > 0, h, NEG_SLOPE * h)


def _depthwise_taps(xt, halo_ref, wt, xloc_ref, *, pad, dilation, ksize):
    """Depthwise (grouped) conv along the tile's time axis using a tiny halo.

    The halo'd tile is assembled in a VMEM scratch so every tap is a plain
    static slice; the tile itself is stored at a sublane-aligned offset.
    Returns the pre-activation flattened to (N*TILE_T, C).
    """
    N, TT, C = xt.shape
    if pad > 0:
        halo = halo_ref[0]                          # (N, 2*pad, C)
        pad8 = (pad + 7) // 8 * 8                   # aligned center offset
        xloc_ref[:, pad8 - pad:pad8, :] = halo[:, :pad, :]        # left halo
        xloc_ref[:, pad8:pad8 + TT, :] = xt                       # center
        xloc_ref[:, pad8 + TT:pad8 + TT + pad, :] = halo[:, pad:, :]  # right
        base = pad8 - pad
    else:
        base = 0
    h = jnp.zeros((N, TT, C), jnp.float32)
    for k in range(ksize):                          # static unrolled taps
        off = base + k * dilation
        src = xloc_ref[:, off:off + TT, :] if pad > 0 else xt
        h = h + src * wt[k:k + 1, :]
    return h.reshape(N * TT, C)


def _stats_kernel(x_ref, halo_ref, wf_ref, wt_ref, bnp_ref, stats_ref,
                  xloc_ref, *, dilation, ksize, pad, n_rows):
    """Pass 1: global per-channel sum / sum-of-squares of h_f and h_t,
    folded into BN scale/shift (rows: scale_f, shift_f, scale_t, shift_t)."""
    i = pl.program_id(0)
    N, TT, C = x_ref.shape

    @pl.when(i == 0)
    def _init():
        stats_ref[...] = jnp.zeros_like(stats_ref)

    xt = x_ref[...]                                 # (N, TT, C)
    x2 = xt.reshape(N * TT, C)

    # block_f pre-activation (1x1 conv, weights pre-transposed to (Cin, Cout)).
    h_f = jnp.dot(x2, wf_ref[...], preferred_element_type=jnp.float32)
    # block_t pre-activation (depthwise conv with halo).
    h_t = _depthwise_taps(xt, halo_ref, wt_ref[...], xloc_ref,
                          pad=pad, dilation=dilation, ksize=ksize)

    stats_ref[0:1, :] += jnp.sum(h_f, axis=0, keepdims=True)
    stats_ref[1:2, :] += jnp.sum(h_f * h_f, axis=0, keepdims=True)
    stats_ref[2:3, :] += jnp.sum(h_t, axis=0, keepdims=True)
    stats_ref[3:4, :] += jnp.sum(h_t * h_t, axis=0, keepdims=True)

    @pl.when(i == pl.num_programs(0) - 1)
    def _finalize():
        s = stats_ref[...]                          # (4, C) sums
        inv_n = 1.0 / float(n_rows)
        mu_f = s[0:1, :] * inv_n
        var_f = s[1:2, :] * inv_n - mu_f * mu_f
        mu_t = s[2:3, :] * inv_n
        var_t = s[3:4, :] * inv_n - mu_t * mu_t
        g_f, b_f = bnp_ref[0:1, :], bnp_ref[1:2, :]
        g_t, b_t = bnp_ref[2:3, :], bnp_ref[3:4, :]
        scale_f = g_f * jax.lax.rsqrt(var_f + EPS)
        scale_t = g_t * jax.lax.rsqrt(var_t + EPS)
        stats_ref[0:1, :] = scale_f
        stats_ref[1:2, :] = b_f - mu_f * scale_f
        stats_ref[2:3, :] = scale_t
        stats_ref[3:4, :] = b_t - mu_t * scale_t


def _apply_kernel(x_ref, halo_ref, wcat_ref, bs_ref, wt_ref, stats_ref,
                  o_ref, xloc_ref, *, dilation, ksize, pad):
    """Pass 2: recompute pre-activations, apply BN scale/shift + LeakyReLU,
    accumulate the three residual branches and write the output tile."""
    N, TT, C = x_ref.shape
    xt = x_ref[...]
    x2 = xt.reshape(N * TT, C)

    # Fused shortcut + block_f 1x1 convs: one (rows, C) x (C, 2C) MXU matmul.
    hcat = jnp.dot(x2, wcat_ref[...], preferred_element_type=jnp.float32)

    # Single residual accumulator (keeps live intermediates minimal).
    y = hcat[:, :C] + bs_ref[...]                                 # shortcut
    y = y + _leaky_relu(hcat[:, C:] * stats_ref[0:1, :] + stats_ref[1:2, :])

    h_t = _depthwise_taps(xt, halo_ref, wt_ref[...], xloc_ref,
                          pad=pad, dilation=dilation, ksize=ksize)
    y = y + _leaky_relu(h_t * stats_ref[2:3, :] + stats_ref[3:4, :])

    o_ref[...] = y.reshape(N, TT, C)


def _pick_tile_t(T, n, c, tile_t=None):
    """Largest multiple-of-8 divisor of T within the VMEM budget, else T."""
    if tile_t is None:
        tile_t = max(8, TILE_TARGET_BYTES // (n * c * 4))
    tile_t = min(tile_t, T)
    if tile_t == T:
        return T
    cand = tile_t - tile_t % 8
    while cand >= 8:
        if T % cand == 0:
            return cand
        cand -= 8
    # TODO(synk): pad T to a tile multiple and mask the BN stats for lengths
    # with no multiple-of-8 divisor; fall back to a single tile for now.
    return T


def resblock1dtf_forward(x_nct, params, *, dilation=1, kernel_size=3,
                         tile_t=None):
    """x_nct: (N, C, T) float32, PyTorch layout. Returns (N, C, T)."""
    wt_t, wf_t, ws_t, bs, gt, bt, gf, bf = params
    pad = dilation * (kernel_size // 2)
    N, C, T = x_nct.shape
    assert pad < T, "reflection pad must be smaller than the sequence length"

    # Layout glue: channels-last so C maps to TPU lanes.
    x = jnp.transpose(x_nct, (0, 2, 1)).astype(jnp.float32)       # (N, T, C)

    tt = _pick_tile_t(T, N, C, tile_t)
    num_tiles = T // tt
    pad8 = (pad + 7) // 8 * 8

    # Tiny per-tile halos for the depthwise conv (reflection at sequence ends).
    if pad > 0:
        j = np.arange(pad)
        tiles = np.arange(num_tiles)[:, None]
        idx = np.concatenate([tiles * tt - pad + j[None, :],       # left
                              (tiles + 1) * tt + j[None, :]], axis=1)  # right
        idx = np.where(idx < 0, -idx, idx)
        idx = np.where(idx >= T, 2 * (T - 1) - idx, idx)           # reflect
        halos = jnp.transpose(
            x[:, idx.reshape(-1), :].reshape(N, num_tiles, 2 * pad, C),
            (1, 0, 2, 3))                                          # (nt,N,2p,C)
        halo_w = 2 * pad
    else:
        halos = jnp.zeros((num_tiles, N, 1, C), jnp.float32)
        halo_w = 1

    # Weight glue: pre-transpose to (C_in, C_out); fuse shortcut + block_f.
    wt = jnp.transpose(wt_t[:, 0, :], (1, 0)).astype(jnp.float32)     # (K, C)
    wf = jnp.transpose(wf_t[:, :, 0], (1, 0)).astype(jnp.float32)     # (C, C)
    ws = jnp.transpose(ws_t[:, :, 0], (1, 0)).astype(jnp.float32)     # (C, C)
    wcat = jnp.concatenate([ws, wf], axis=1)                          # (C, 2C)
    bs2 = bs[None, :].astype(jnp.float32)                             # (1, C)
    bnp = jnp.stack([gf, bf, gt, bt], axis=0).astype(jnp.float32)     # (4, C)

    x_spec = pl.BlockSpec((N, tt, C), lambda i: (0, i, 0))
    halo_spec = pl.BlockSpec((1, N, halo_w, C), lambda i: (i, 0, 0, 0))
    wf_spec = pl.BlockSpec((C, C), lambda i: (0, 0))
    wcat_spec = pl.BlockSpec((C, 2 * C), lambda i: (0, 0))
    wt_spec = pl.BlockSpec((kernel_size, C), lambda i: (0, 0))
    bnp_spec = pl.BlockSpec((4, C), lambda i: (0, 0))
    bs_spec = pl.BlockSpec((1, C), lambda i: (0, 0))
    stats_spec = pl.BlockSpec((4, C), lambda i: (0, 0))
    out_spec = pl.BlockSpec((N, tt, C), lambda i: (0, i, 0))

    # Pass 1: global BN statistics -> per-channel scale/shift (4, C).
    stats = pl.pallas_call(
        functools.partial(_stats_kernel, dilation=dilation, ksize=kernel_size,
                          pad=pad, n_rows=N * T),
        grid=(num_tiles,),
        in_specs=[x_spec, halo_spec, wf_spec, wt_spec, bnp_spec],
        out_specs=stats_spec,
        out_shape=jax.ShapeDtypeStruct((4, C), jnp.float32),
        scratch_shapes=[pltpu.VMEM((N, tt + 2 * pad8, C), jnp.float32)],
        compiler_params=pltpu.CompilerParams(
            dimension_semantics=("arbitrary",),
            vmem_limit_bytes=VMEM_LIMIT),
    )(x, halos, wf, wt, bnp)

    # Pass 2: recompute h, apply BN + LeakyReLU, residual sum, write output.
    out = pl.pallas_call(
        functools.partial(_apply_kernel, dilation=dilation, ksize=kernel_size,
                          pad=pad),
        grid=(num_tiles,),
        in_specs=[x_spec, halo_spec, wcat_spec, bs_spec, wt_spec, stats_spec],
        out_specs=out_spec,
        out_shape=jax.ShapeDtypeStruct((N, T, C), jnp.float32),
        scratch_shapes=[pltpu.VMEM((N, tt + 2 * pad8, C), jnp.float32)],
        compiler_params=pltpu.CompilerParams(
            dimension_semantics=("parallel",),
            vmem_limit_bytes=VMEM_LIMIT),
    )(x, halos, wcat, bs2, wt, stats)

    return jnp.transpose(out, (0, 2, 1))            # back to PyTorch (N, C, T)


def ref_forward(x, params, *, dilation=1, kernel_size=3):
    """Pure-JAX reference in PyTorch NCT layout (training-mode BatchNorm)."""
    wt_t, wf_t, ws_t, bs, gt, bt, gf, bf = params
    pad = dilation * (kernel_size // 2)
    N, C, T = x.shape

    def bn(h, g, b):   # biased variance over (N, T)
        mu = jnp.mean(h, axis=(0, 2), keepdims=True)
        var = jnp.mean((h - mu) ** 2, axis=(0, 2), keepdims=True)
        return (h - mu) / jnp.sqrt(var + EPS) * g[None, :, None] + b[None, :, None]

    sc = jnp.einsum("oc,nct->not", ws_t[:, :, 0], x) + bs[None, :, None]
    hf = jnp.einsum("oc,nct->not", wf_t[:, :, 0], x)
    yf = _leaky_relu(bn(hf, gf, bf))
    xp = jnp.pad(x, ((0, 0), (0, 0), (pad, pad)), mode="reflect")
    ht = jnp.zeros_like(x)
    for k in range(kernel_size):
        ht = ht + xp[:, :, k * dilation:k * dilation + T] * wt_t[:, 0, k][None, :, None]
    yt = _leaky_relu(bn(ht, gt, bt))
    return sc + yf + yt


def _make_params(key, C, kernel_size):
    ks = jax.random.split(key, 8)
    wt_t = jax.random.normal(ks[0], (C, 1, kernel_size), jnp.float32) * 0.3
    wf_t = jax.random.normal(ks[1], (C, C, 1), jnp.float32) * 0.2
    ws_t = jax.random.normal(ks[2], (C, C, 1), jnp.float32) * 0.2
    bs = jax.random.normal(ks[3], (C,), jnp.float32) * 0.1
    gt = 1.0 + 0.1 * jax.random.normal(ks[4], (C,), jnp.float32)
    bt = 0.1 * jax.random.normal(ks[5], (C,), jnp.float32)
    gf = 1.0 + 0.1 * jax.random.normal(ks[6], (C,), jnp.float32)
    bf = 0.1 * jax.random.normal(ks[7], (C,), jnp.float32)
    return (wt_t, wf_t, ws_t, bs, gt, bt, gf, bf)


if __name__ == "__main__":
    key = jax.random.PRNGKey(0)
    #          N,   C,   T, dilation, kernel_size, tile_t
    configs = [(2, 128, 256, 1, 3, 64),
               (2, 128, 192, 2, 5, 64)]
    for (N, C, T, dil, ksz, tt) in configs:
        kx, kp, key = jax.random.split(key, 3)
        x = jax.random.normal(kx, (N, C, T), jnp.float32)
        params = _make_params(kp, C, ksz)

        fwd = jax.jit(functools.partial(resblock1dtf_forward,
                                        dilation=dil, kernel_size=ksz,
                                        tile_t=tt))
        out = jax.block_until_ready(fwd(x, params))

        ref = ref_forward(x, params, dilation=dil, kernel_size=ksz)
        np.testing.assert_allclose(np.asarray(out), np.asarray(ref),
                                   rtol=1e-4, atol=1e-4)
    print("KERNEL_OK")
</pallas_src>

<mosaic_0001>
module attributes {stable_mosaic.version = 11 : i64} {
  func.func @_stats_kernel(%arg0: i32, %arg1: memref<2x64x128xf32, #tpu.memory_space<vmem>>, %arg2: memref<1x2x2x128xf32, #tpu.memory_space<vmem>>, %arg3: memref<128x128xf32, #tpu.memory_space<vmem>>, %arg4: memref<3x128xf32, #tpu.memory_space<vmem>>, %arg5: memref<4x128xf32, #tpu.memory_space<vmem>>, %arg6: memref<4x128xf32, #tpu.memory_space<vmem>>, %arg7: memref<2x80x128xf32, #tpu.memory_space<vmem>>) attributes {dimension_semantics = [#tpu.dimension_semantics<arbitrary>], iteration_bounds = array<i64: 4>, scalar_prefetch = 0 : i64, scratch_operands = 1 : i64, tpu.core_type = #tpu.core_type<tc>, window_params = [{transform_indices = @transform_0, window_bounds = array<i64: 2, 64, 128>}, {transform_indices = @transform_1, window_bounds = array<i64: 1, 2, 2, 128>}, {pipeline_mode = #tpu.pipeline_mode<synchronous>, transform_indices = @transform_2, window_bounds = array<i64: 128, 128>}, {pipeline_mode = #tpu.pipeline_mode<synchronous>, transform_indices = @transform_3, window_bounds = array<i64: 3, 128>}, {pipeline_mode = #tpu.pipeline_mode<synchronous>, transform_indices = @transform_4, window_bounds = array<i64: 4, 128>}, {pipeline_mode = #tpu.pipeline_mode<synchronous>, transform_indices = @transform_5, window_bounds = array<i64: 4, 128>}]} {
    %c0_i32 = arith.constant 0 : i32
    %0 = arith.cmpi eq, %arg0, %c0_i32 : i32
    %1 = arith.extui %0 : i1 to i32
    %c0_i32_0 = arith.constant 0 : i32
    %2 = arith.cmpi ne, %1, %c0_i32_0 : i32
    scf.if %2 {
      %cst_44 = arith.constant 0.000000e+00 : f32
      %60 = vector.broadcast %cst_44 : f32 to vector<4x128xf32>
      %c0_45 = arith.constant 0 : index
      %c0_46 = arith.constant 0 : index
      %61 = vector.load %arg6[%c0_45, %c0_46] : memref<4x128xf32, #tpu.memory_space<vmem>>, vector<4x128xf32>
      tpu.vector_store %arg6[%c0_45, %c0_46], %60 {strides = array<i32>} : memref<4x128xf32, #tpu.memory_space<vmem>>, vector<4x128xf32>,
    } else {
    }
    %c0 = arith.constant 0 : index
    %c0_1 = arith.constant 0 : index
    %c0_2 = arith.constant 0 : index
    %3 = vector.load %arg1[%c0, %c0_1, %c0_2] : memref<2x64x128xf32, #tpu.memory_space<vmem>>, vector<2x64x128xf32>
    %4 = vector.shape_cast %3 : vector<2x64x128xf32> to vector<128x128xf32>
    %c0_3 = arith.constant 0 : index
    %c0_4 = arith.constant 0 : index
    %5 = vector.load %arg3[%c0_3, %c0_4] : memref<128x128xf32, #tpu.memory_space<vmem>>, vector<128x128xf32>
    %cst = arith.constant dense<0.000000e+00> : vector<128x128xf32>
    %6 = tpu.matmul %4, %5, %cst {dimension_numbers = #tpu.dot_dimension_numbers<[1], [0], [0], [1], [0, 0, 1, 1], [], []>} : vector<128x128xf32>, vector<128x128xf32>, vector<128x128xf32> -> vector<128x128xf32>
    %c0_5 = arith.constant 0 : index
    %c0_6 = arith.constant 0 : index
    %7 = vector.load %arg4[%c0_5, %c0_6] : memref<3x128xf32, #tpu.memory_space<vmem>>, vector<3x128xf32>
    %c0_7 = arith.constant 0 : index
    %c0_8 = arith.constant 0 : index
    %c0_9 = arith.constant 0 : index
    %c0_10 = arith.constant 0 : index
    %8 = vector.load %arg2[%c0_7, %c0_8, %c0_9, %c0_10] : memref<1x2x2x128xf32, #tpu.memory_space<vmem>>, vector<1x2x2x128xf32>
    %9 = vector.shape_cast %8 : vector<1x2x2x128xf32> to vector<2x2x128xf32>
    %10 = vector.extract_strided_slice %9 {offsets = [0, 0, 0], sizes = [2, 1, 128], strides = [1, 1, 1]} : vector<2x2x128xf32> to vector<2x1x128xf32>
    %c0_11 = arith.constant 0 : index
    %c7 = arith.constant 7 : index
    %c0_12 = arith.constant 0 : index
    %11 = vector.load %arg7[%c0_11, %c7, %c0_12] : memref<2x80x128xf32, #tpu.memory_space<vmem>>, vector<2x1x128xf32>
    tpu.vector_store %arg7[%c0_11, %c7, %c0_12], %10 {strides = array<i32>} : memref<2x80x128xf32, #tpu.memory_space<vmem>>, vector<2x1x128xf32>,
    %c0_13 = arith.constant 0 : index
    %c8 = arith.constant 8 : index
    %c0_14 = arith.constant 0 : index
    %12 = vector.load %arg7[%c0_13, %c8, %c0_14] : memref<2x80x128xf32, #tpu.memory_space<vmem>>, vector<2x64x128xf32>
    tpu.vector_store %arg7[%c0_13, %c8, %c0_14], %3 {strides = array<i32>} : memref<2x80x128xf32, #tpu.memory_space<vmem>>, vector<2x64x128xf32>,
    %13 = vector.extract_strided_slice %9 {offsets = [0, 1, 0], sizes = [2, 1, 128], strides = [1, 1, 1]} : vector<2x2x128xf32> to vector<2x1x128xf32>
    %c0_15 = arith.constant 0 : index
    %c72 = arith.constant 72 : index
    %c0_16 = arith.constant 0 : index
    %14 = vector.load %arg7[%c0_15, %c72, %c0_16] : memref<2x80x128xf32, #tpu.memory_space<vmem>>, vector<2x1x128xf32>
    tpu.vector_store %arg7[%c0_15, %c72, %c0_16], %13 {strides = array<i32>} : memref<2x80x128xf32, #tpu.memory_space<vmem>>, vector<2x1x128xf32>,
    %cst_17 = arith.constant 0.000000e+00 : f32
    %15 = vector.broadcast %cst_17 : f32 to vector<2x64x128xf32>
    %c0_18 = arith.constant 0 : index
    %c7_19 = arith.constant 7 : index
    %c0_20 = arith.constant 0 : index
    %16 = vector.load %arg7[%c0_18, %c7_19, %c0_20] : memref<2x80x128xf32, #tpu.memory_space<vmem>>, vector<2x64x128xf32>
    %17 = vector.extract_strided_slice %7 {offsets = [0, 0], sizes = [1, 128], strides = [1, 1]} : vector<3x128xf32> to vector<1x128xf32>
    %18 = vector.shape_cast %17 : vector<1x128xf32> to vector<1x1x128xf32>
    %19 = vector.broadcast %18 : vector<1x1x128xf32> to vector<2x64x128xf32>
    %20 = arith.mulf %16, %19 : vector<2x64x128xf32>
    %21 = arith.addf %15, %20 : vector<2x64x128xf32>
    %c0_21 = arith.constant 0 : index
    %c8_22 = arith.constant 8 : index
    %c0_23 = arith.constant 0 : index
    %22 = vector.load %arg7[%c0_21, %c8_22, %c0_23] : memref<2x80x128xf32, #tpu.memory_space<vmem>>, vector<2x64x128xf32>
    %23 = vector.extract_strided_slice %7 {offsets = [1, 0], sizes = [1, 128], strides = [1, 1]} : vector<3x128xf32> to vector<1x128xf32>
    %24 = vector.shape_cast %23 : vector<1x128xf32> to vector<1x1x128xf32>
    %25 = vector.broadcast %24 : vector<1x1x128xf32> to vector<2x64x128xf32>
    %26 = arith.mulf %22, %25 : vector<2x64x128xf32>
    %27 = arith.addf %21, %26 : vector<2x64x128xf32>
    %c0_24 = arith.constant 0 : index
    %c9 = arith.constant 9 : index
    %c0_25 = arith.constant 0 : index
    %28 = vector.load %arg7[%c0_24, %c9, %c0_25] : memref<2x80x128xf32, #tpu.memory_space<vmem>>, vector<2x64x128xf32>
    %29 = vector.extract_strided_slice %7 {offsets = [2, 0], sizes = [1, 128], strides = [1, 1]} : vector<3x128xf32> to vector<1x128xf32>
    %30 = vector.shape_cast %29 : vector<1x128xf32> to vector<1x1x128xf32>
    %31 = vector.broadcast %30 : vector<1x1x128xf32> to vector<2x64x128xf32>
    %32 = arith.mulf %28, %31 : vector<2x64x128xf32>
    %33 = arith.addf %27, %32 : vector<2x64x128xf32>
    %34 = vector.shape_cast %33 : vector<2x64x128xf32> to vector<128x128xf32>
    %c0_26 = arith.constant 0 : index
    %c0_27 = arith.constant 0 : index
    %35 = vector.load %arg6[%c0_26, %c0_27] : memref<4x128xf32, #tpu.memory_space<vmem>>, vector<1x128xf32>
    %cst_28 = arith.constant dense<0.000000e+00> : vector<128xf32>
    %36 = vector.multi_reduction <add>, %6, %cst_28 [0] : vector<128x128xf32> to vector<128xf32>
    %37 = vector.shape_cast %36 : vector<128xf32> to vector<1x128xf32>
    %38 = arith.addf %35, %37 : vector<1x128xf32>
    %c0_29 = arith.constant 0 : index
    %c0_30 = arith.constant 0 : index
    %39 = vector.load %arg6[%c0_29, %c0_30] : memref<4x128xf32, #tpu.memory_space<vmem>>, vector<1x128xf32>
    tpu.vector_store %arg6[%c0_29, %c0_30], %38 {strides = array<i32>} : memref<4x128xf32, #tpu.memory_space<vmem>>, vector<1x128xf32>,
    %c1 = arith.constant 1 : index
    %c0_31 = arith.constant 0 : index
    %40 = vector.load %arg6[%c1, %c0_31] : memref<4x128xf32, #tpu.memory_space<vmem>>, vector<1x128xf32>
    %41 = arith.mulf %6, %6 : vector<128x128xf32>
    %cst_32 = arith.constant dense<0.000000e+00> : vector<128xf32>
    %42 = vector.multi_reduction <add>, %41, %cst_32 [0] : vector<128x128xf32> to vector<128xf32>
    %43 = vector.shape_cast %42 : vector<128xf32> to vector<1x128xf32>
    %44 = arith.addf %40, %43 : vector<1x128xf32>
    %c1_33 = arith.constant 1 : index
    %c0_34 = arith.constant 0 : index
    %45 = vector.load %arg6[%c1_33, %c0_34] : memref<4x128xf32, #tpu.memory_space<vmem>>, vector<1x128xf32>
    tpu.vector_store %arg6[%c1_33, %c0_34], %44 {strides = array<i32>} : memref<4x128xf32, #tpu.memory_space<vmem>>, vector<1x128xf32>,
    %c2 = arith.constant 2 : index
    %c0_35 = arith.constant 0 : index
    %46 = vector.load %arg6[%c2, %c0_35] : memref<4x128xf32, #tpu.memory_space<vmem>>, vector<1x128xf32>
    %cst_36 = arith.constant dense<0.000000e+00> : vector<128xf32>
    %47 = vector.multi_reduction <add>, %34, %cst_36 [0] : vector<128x128xf32> to vector<128xf32>
    %48 = vector.shape_cast %47 : vector<128xf32> to vector<1x128xf32>
    %49 = arith.addf %46, %48 : vector<1x128xf32>
    %c2_37 = arith.constant 2 : index
    %c0_38 = arith.constant 0 : index
    %50 = vector.load %arg6[%c2_37, %c0_38] : memref<4x128xf32, #tpu.memory_space<vmem>>, vector<1x128xf32>
    tpu.vector_store %arg6[%c2_37, %c0_38], %49 {strides = array<i32>} : memref<4x128xf32, #tpu.memory_space<vmem>>, vector<1x128xf32>,
    %c3 = arith.constant 3 : index
    %c0_39 = arith.constant 0 : index
    %51 = vector.load %arg6[%c3, %c0_39] : memref<4x128xf32, #tpu.memory_space<vmem>>, vector<1x128xf32>
    %52 = arith.mulf %34, %34 : vector<128x128xf32>
    %cst_40 = arith.constant dense<0.000000e+00> : vector<128xf32>
    %53 = vector.multi_reduction <add>, %52, %cst_40 [0] : vector<128x128xf32> to vector<128xf32>
    %54 = vector.shape_cast %53 : vector<128xf32> to vector<1x128xf32>
    %55 = arith.addf %51, %54 : vector<1x128xf32>
    %c3_41 = arith.constant 3 : index
    %c0_42 = arith.constant 0 : index
    %56 = vector.load %arg6[%c3_41, %c0_42] : memref<4x128xf32, #tpu.memory_space<vmem>>, vector<1x128xf32>
    tpu.vector_store %arg6[%c3_41, %c0_42], %55 {strides = array<i32>} : memref<4x128xf32, #tpu.memory_space<vmem>>, vector<1x128xf32>,
    %c3_i32 = arith.constant 3 : i32
    %57 = arith.cmpi eq, %arg0, %c3_i32 : i32
    %58 = arith.extui %57 : i1 to i32
    %c0_i32_43 = arith.constant 0 : i32
    %59 = arith.cmpi ne, %58, %c0_i32_43 : i32
    scf.if %59 {
      %c0_44 = arith.constant 0 : index
      %c0_45 = arith.constant 0 : index
      %60 = vector.load %arg6[%c0_44, %c0_45] : memref<4x128xf32, #tpu.memory_space<vmem>>, vector<4x128xf32>
      %61 = vector.extract_strided_slice %60 {offsets = [0, 0], sizes = [1, 128], strides = [1, 1]} : vector<4x128xf32> to vector<1x128xf32>
      %cst_46 = arith.constant 0.001953125 : f32
      %62 = vector.broadcast %cst_46 : f32 to vector<1x128xf32>
      %63 = arith.mulf %61, %62 : vector<1x128xf32>
      %64 = vector.extract_strided_slice %60 {offsets = [1, 0], sizes = [1, 128], strides = [1, 1]} : vector<4x128xf32> to vector<1x128xf32>
      %cst_47 = arith.constant 0.001953125 : f32
      %65 = vector.broadcast %cst_47 : f32 to vector<1x128xf32>
      %66 = arith.mulf %64, %65 : vector<1x128xf32>
      %67 = arith.mulf %63, %63 : vector<1x128xf32>
      %68 = arith.subf %66, %67 : vector<1x128xf32>
      %69 = vector.extract_strided_slice %60 {offsets = [2, 0], sizes = [1, 128], strides = [1, 1]} : vector<4x128xf32> to vector<1x128xf32>
      %cst_48 = arith.constant 0.001953125 : f32
      %70 = vector.broadcast %cst_48 : f32 to vector<1x128xf32>
      %71 = arith.mulf %69, %70 : vector<1x128xf32>
      %72 = vector.extract_strided_slice %60 {offsets = [3, 0], sizes = [1, 128], strides = [1, 1]} : vector<4x128xf32> to vector<1x128xf32>
      %cst_49 = arith.constant 0.001953125 : f32
      %73 = vector.broadcast %cst_49 : f32 to vector<1x128xf32>
      %74 = arith.mulf %72, %73 : vector<1x128xf32>
      %75 = arith.mulf %71, %71 : vector<1x128xf32>
      %76 = arith.subf %74, %75 : vector<1x128xf32>
      %c0_50 = arith.constant 0 : index
      %c0_51 = arith.constant 0 : index
      %77 = vector.load %arg5[%c0_50, %c0_51] : memref<4x128xf32, #tpu.memory_space<vmem>>, vector<1x128xf32>
      %c1_52 = arith.constant 1 : index
      %c0_53 = arith.constant 0 : index
      %78 = vector.load %arg5[%c1_52, %c0_53] : memref<4x128xf32, #tpu.memory_space<vmem>>, vector<1x128xf32>
      %c2_54 = arith.constant 2 : index
      %c0_55 = arith.constant 0 : index
      %79 = vector.load %arg5[%c2_54, %c0_55] : memref<4x128xf32, #tpu.memory_space<vmem>>, vector<1x128xf32>
      %c3_56 = arith.constant 3 : index
      %c0_57 = arith.constant 0 : index
      %80 = vector.load %arg5[%c3_56, %c0_57] : memref<4x128xf32, #tpu.memory_space<vmem>>, vector<1x128xf32>
      %cst_58 = arith.constant 9.99999974E-6 : f32
      %81 = vector.broadcast %cst_58 : f32 to vector<1x128xf32>
      %82 = arith.addf %68, %81 : vector<1x128xf32>
      %83 = math.rsqrt %82 : vector<1x128xf32>
      %84 = arith.mulf %77, %83 : vector<1x128xf32>
      %cst_59 = arith.constant 9.99999974E-6 : f32
      %85 = vector.broadcast %cst_59 : f32 to vector<1x128xf32>
      %86 = arith.addf %76, %85 : vector<1x128xf32>
      %87 = math.rsqrt %86 : vector<1x128xf32>
      %88 = arith.mulf %79, %87 : vector<1x128xf32>
      %c0_60 = arith.constant 0 : index
      %c0_61 = arith.constant 0 : index
      %89 = vector.load %arg6[%c0_60, %c0_61] : memref<4x128xf32, #tpu.memory_space<vmem>>, vector<1x128xf32>
      tpu.vector_store %arg6[%c0_60, %c0_61], %84 {strides = array<i32>} : memref<4x128xf32, #tpu.memory_space<vmem>>, vector<1x128xf32>,
      %90 = arith.mulf %63, %84 : vector<1x128xf32>
      %91 = arith.subf %78, %90 : vector<1x128xf32>
      %c1_62 = arith.constant 1 : index
      %c0_63 = arith.constant 0 : index
      %92 = vector.load %arg6[%c1_62, %c0_63] : memref<4x128xf32, #tpu.memory_space<vmem>>, vector<1x128xf32>
      tpu.vector_store %arg6[%c1_62, %c0_63], %91 {strides = array<i32>} : memref<4x128xf32, #tpu.memory_space<vmem>>, vector<1x128xf32>,
      %c2_64 = arith.constant 2 : index
      %c0_65 = arith.constant 0 : index
      %93 = vector.load %arg6[%c2_64, %c0_65] : memref<4x128xf32, #tpu.memory_space<vmem>>, vector<1x128xf32>
      tpu.vector_store %arg6[%c2_64, %c0_65], %88 {strides = array<i32>} : memref<4x128xf32, #tpu.memory_space<vmem>>, vector<1x128xf32>,
      %94 = arith.mulf %71, %88 : vector<1x128xf32>
      %95 = arith.subf %80, %94 : vector<1x128xf32>
      %c3_66 = arith.constant 3 : index
      %c0_67 = arith.constant 0 : index
      %96 = vector.load %arg6[%c3_66, %c0_67] : memref<4x128xf32, #tpu.memory_space<vmem>>, vector<1x128xf32>
      tpu.vector_store %arg6[%c3_66, %c0_67], %95 {strides = array<i32>} : memref<4x128xf32, #tpu.memory_space<vmem>>, vector<1x128xf32>,
    } else {
    }
    return
  }
  func.func @transform_0(%arg0: i32) -> (i32, i32, i32) {
    %c0_i32 = arith.constant 0 : i32
    %c0_i32_0 = arith.constant 0 : i32
    %c0_i32_1 = arith.constant 0 : i32
    return %c0_i32, %arg0, %c0_i32_0 : i32, i32, i32
  }
  func.func @transform_1(%arg0: i32) -> (i32, i32, i32, i32) {
    %c0_i32 = arith.constant 0 : i32
    %c0_i32_0 = arith.constant 0 : i32
    %c0_i32_1 = arith.constant 0 : i32
    %c0_i32_2 = arith.constant 0 : i32
    return %arg0, %c0_i32, %c0_i32_0, %c0_i32_1 : i32, i32, i32, i32
  }
  func.func @transform_2(%arg0: i32) -> (i32, i32) {
    %c0_i32 = arith.constant 0 : i32
    %c0_i32_0 = arith.constant 0 : i32
    %c0_i32_1 = arith.constant 0 : i32
    return %c0_i32, %c0_i32_0 : i32, i32
  }
  func.func @transform_3(%arg0: i32) -> (i32, i32) {
    %c0_i32 = arith.constant 0 : i32
    %c0_i32_0 = arith.constant 0 : i32
    %c0_i32_1 = arith.constant 0 : i32
    return %c0_i32, %c0_i32_0 : i32, i32
  }
  func.func @transform_4(%arg0: i32) -> (i32, i32) {
    %c0_i32 = arith.constant 0 : i32
    %c0_i32_0 = arith.constant 0 : i32
    %c0_i32_1 = arith.constant 0 : i32
    return %c0_i32, %c0_i32_0 : i32, i32
  }
  func.func @transform_5(%arg0: i32) -> (i32, i32) {
    %c0_i32 = arith.constant 0 : i32
    %c0_i32_0 = arith.constant 0 : i32
    %c0_i32_1 = arith.constant 0 : i32
    return %c0_i32, %c0_i32_0 : i32, i32
  }
}

module attributes {stable_mosaic.version = 11 : i64} {
  func.func @_apply_kernel(%arg0: i32, %arg1: memref<2x64x128xf32, #tpu.memory_space<vmem>>, %arg2: memref<1x2x2x128xf32, #tpu.memory_space<vmem>>, %arg3: memref<128x256xf32, #tpu.memory_space<vmem>>, %arg4: memref<1x128xf32, #tpu.memory_space<vmem>>, %arg5: memref<3x128xf32, #tpu.memory_space<vmem>>, %arg6: memref<4x128xf32, #tpu.memory_space<vmem>>, %arg7: memref<2x64x128xf32, #tpu.memory_space<vmem>>, %arg8: memref<2x80x128xf32, #tpu.memory_space<vmem>>) attributes {dimension_semantics = [#tpu.dimension_semantics<parallel>], iteration_bounds = array<i64: 4>, scalar_prefetch = 0 : i64, scratch_operands = 1 : i64, tpu.core_type = #tpu.core_type<tc>, window_params = [{transform_indices = @transform_0, window_bounds = array<i64: 2, 64, 128>}, {transform_indices = @transform_1, window_bounds = array<i64: 1, 2, 2, 128>}, {pipeline_mode = #tpu.pipeline_mode<synchronous>, transform_indices = @transform_2, window_bounds = array<i64: 128, 256>}, {pipeline_mode = #tpu.pipeline_mode<synchronous>, transform_indices = @transform_3, window_bounds = array<i64: 1, 128>}, {pipeline_mode = #tpu.pipeline_mode<synchronous>, transform_indices = @transform_4, window_bounds = array<i64: 3, 128>}, {pipeline_mode = #tpu.pipeline_mode<synchronous>, transform_indices = @transform_5, window_bounds = array<i64: 4, 128>}, {transform_indices = @transform_6, window_bounds = array<i64: 2, 64, 128>}]} {
    %c0 = arith.constant 0 : index
    %c0_0 = arith.constant 0 : index
    %c0_1 = arith.constant 0 : index
    %0 = vector.load %arg1[%c0, %c0_0, %c0_1] : memref<2x64x128xf32, #tpu.memory_space<vmem>>, vector<2x64x128xf32>
    %1 = vector.shape_cast %0 : vector<2x64x128xf32> to vector<128x128xf32>
    %c0_2 = arith.constant 0 : index
    %c0_3 = arith.constant 0 : index
    %2 = vector.load %arg3[%c0_2, %c0_3] : memref<128x256xf32, #tpu.memory_space<vmem>>, vector<128x256xf32>
    %cst = arith.constant dense<0.000000e+00> : vector<128x256xf32>
    %3 = tpu.matmul %1, %2, %cst {dimension_numbers = #tpu.dot_dimension_numbers<[1], [0], [0], [1], [0, 0, 1, 1], [], []>} : vector<128x128xf32>, vector<128x256xf32>, vector<128x256xf32> -> vector<128x256xf32>
    %4 = vector.extract_strided_slice %3 {offsets = [0, 0], sizes = [128, 128], strides = [1, 1]} : vector<128x256xf32> to vector<128x128xf32>
    %c0_4 = arith.constant 0 : index
    %c0_5 = arith.constant 0 : index
    %5 = vector.load %arg4[%c0_4, %c0_5] : memref<1x128xf32, #tpu.memory_space<vmem>>, vector<1x128xf32>
    %6 = vector.broadcast %5 : vector<1x128xf32> to vector<128x128xf32>
    %7 = arith.addf %4, %6 : vector<128x128xf32>
    %8 = vector.extract_strided_slice %3 {offsets = [0, 128], sizes = [128, 128], strides = [1, 1]} : vector<128x256xf32> to vector<128x128xf32>
    %c0_6 = arith.constant 0 : index
    %c0_7 = arith.constant 0 : index
    %9 = vector.load %arg6[%c0_6, %c0_7] : memref<4x128xf32, #tpu.memory_space<vmem>>, vector<1x128xf32>
    %10 = vector.broadcast %9 : vector<1x128xf32> to vector<128x128xf32>
    %11 = arith.mulf %8, %10 : vector<128x128xf32>
    %c1 = arith.constant 1 : index
    %c0_8 = arith.constant 0 : index
    %12 = vector.load %arg6[%c1, %c0_8] : memref<4x128xf32, #tpu.memory_space<vmem>>, vector<1x128xf32>
    %13 = vector.broadcast %12 : vector<1x128xf32> to vector<128x128xf32>
    %14 = arith.addf %11, %13 : vector<128x128xf32>
    %cst_9 = arith.constant 0.000000e+00 : f32
    %15 = vector.broadcast %cst_9 : f32 to vector<128x128xf32>
    %16 = arith.cmpf ogt, %14, %15 : vector<128x128xf32>
    %cst_10 = arith.constant 2.000000e-01 : f32
    %17 = vector.broadcast %cst_10 : f32 to vector<128x128xf32>
    %18 = arith.mulf %17, %14 : vector<128x128xf32>
    %19 = arith.select %16, %14, %18 : vector<128x128xi1>, vector<128x128xf32>
    %20 = arith.addf %7, %19 : vector<128x128xf32>
    %c0_11 = arith.constant 0 : index
    %c0_12 = arith.constant 0 : index
    %21 = vector.load %arg5[%c0_11, %c0_12] : memref<3x128xf32, #tpu.memory_space<vmem>>, vector<3x128xf32>
    %c0_13 = arith.constant 0 : index
    %c0_14 = arith.constant 0 : index
    %c0_15 = arith.constant 0 : index
    %c0_16 = arith.constant 0 : index
    %22 = vector.load %arg2[%c0_13, %c0_14, %c0_15, %c0_16] : memref<1x2x2x128xf32, #tpu.memory_space<vmem>>, vector<1x2x2x128xf32>
    %23 = vector.shape_cast %22 : vector<1x2x2x128xf32> to vector<2x2x128xf32>
    %24 = vector.extract_strided_slice %23 {offsets = [0, 0, 0], sizes = [2, 1, 128], strides = [1, 1, 1]} : vector<2x2x128xf32> to vector<2x1x128xf32>
    %c0_17 = arith.constant 0 : index
    %c7 = arith.constant 7 : index
    %c0_18 = arith.constant 0 : index
    %25 = vector.load %arg8[%c0_17, %c7, %c0_18] : memref<2x80x128xf32, #tpu.memory_space<vmem>>, vector<2x1x128xf32>
    tpu.vector_store %arg8[%c0_17, %c7, %c0_18], %24 {strides = array<i32>} : memref<2x80x128xf32, #tpu.memory_space<vmem>>, vector<2x1x128xf32>,
    %c0_19 = arith.constant 0 : index
    %c8 = arith.constant 8 : index
    %c0_20 = arith.constant 0 : index
    %26 = vector.load %arg8[%c0_19, %c8, %c0_20] : memref<2x80x128xf32, #tpu.memory_space<vmem>>, vector<2x64x128xf32>
    tpu.vector_store %arg8[%c0_19, %c8, %c0_20], %0 {strides = array<i32>} : memref<2x80x128xf32, #tpu.memory_space<vmem>>, vector<2x64x128xf32>,
    %27 = vector.extract_strided_slice %23 {offsets = [0, 1, 0], sizes = [2, 1, 128], strides = [1, 1, 1]} : vector<2x2x128xf32> to vector<2x1x128xf32>
    %c0_21 = arith.constant 0 : index
    %c72 = arith.constant 72 : index
    %c0_22 = arith.constant 0 : index
    %28 = vector.load %arg8[%c0_21, %c72, %c0_22] : memref<2x80x128xf32, #tpu.memory_space<vmem>>, vector<2x1x128xf32>
    tpu.vector_store %arg8[%c0_21, %c72, %c0_22], %27 {strides = array<i32>} : memref<2x80x128xf32, #tpu.memory_space<vmem>>, vector<2x1x128xf32>,
    %cst_23 = arith.constant 0.000000e+00 : f32
    %29 = vector.broadcast %cst_23 : f32 to vector<2x64x128xf32>
    %c0_24 = arith.constant 0 : index
    %c7_25 = arith.constant 7 : index
    %c0_26 = arith.constant 0 : index
    %30 = vector.load %arg8[%c0_24, %c7_25, %c0_26] : memref<2x80x128xf32, #tpu.memory_space<vmem>>, vector<2x64x128xf32>
    %31 = vector.extract_strided_slice %21 {offsets = [0, 0], sizes = [1, 128], strides = [1, 1]} : vector<3x128xf32> to vector<1x128xf32>
    %32 = vector.shape_cast %31 : vector<1x128xf32> to vector<1x1x128xf32>
    %33 = vector.broadcast %32 : vector<1x1x128xf32> to vector<2x64x128xf32>
    %34 = arith.mulf %30, %33 : vector<2x64x128xf32>
    %35 = arith.addf %29, %34 : vector<2x64x128xf32>
    %c0_27 = arith.constant 0 : index
    %c8_28 = arith.constant 8 : index
    %c0_29 = arith.constant 0 : index
    %36 = vector.load %arg8[%c0_27, %c8_28, %c0_29] : memref<2x80x128xf32, #tpu.memory_space<vmem>>, vector<2x64x128xf32>
    %37 = vector.extract_strided_slice %21 {offsets = [1, 0], sizes = [1, 128], strides = [1, 1]} : vector<3x128xf32> to vector<1x128xf32>
    %38 = vector.shape_cast %37 : vector<1x128xf32> to vector<1x1x128xf32>
    %39 = vector.broadcast %38 : vector<1x1x128xf32> to vector<2x64x128xf32>
    %40 = arith.mulf %36, %39 : vector<2x64x128xf32>
    %41 = arith.addf %35, %40 : vector<2x64x128xf32>
    %c0_30 = arith.constant 0 : index
    %c9 = arith.constant 9 : index
    %c0_31 = arith.constant 0 : index
    %42 = vector.load %arg8[%c0_30, %c9, %c0_31] : memref<2x80x128xf32, #tpu.memory_space<vmem>>, vector<2x64x128xf32>
    %43 = vector.extract_strided_slice %21 {offsets = [2, 0], sizes = [1, 128], strides = [1, 1]} : vector<3x128xf32> to vector<1x128xf32>
    %44 = vector.shape_cast %43 : vector<1x128xf32> to vector<1x1x128xf32>
    %45 = vector.broadcast %44 : vector<1x1x128xf32> to vector<2x64x128xf32>
    %46 = arith.mulf %42, %45 : vector<2x64x128xf32>
    %47 = arith.addf %41, %46 : vector<2x64x128xf32>
    %48 = vector.shape_cast %47 : vector<2x64x128xf32> to vector<128x128xf32>
    %c2 = arith.constant 2 : index
    %c0_32 = arith.constant 0 : index
    %49 = vector.load %arg6[%c2, %c0_32] : memref<4x128xf32, #tpu.memory_space<vmem>>, vector<1x128xf32>
    %50 = vector.broadcast %49 : vector<1x128xf32> to vector<128x128xf32>
    %51 = arith.mulf %48, %50 : vector<128x128xf32>
    %c3 = arith.constant 3 : index
    %c0_33 = arith.constant 0 : index
    %52 = vector.load %arg6[%c3, %c0_33] : memref<4x128xf32, #tpu.memory_space<vmem>>, vector<1x128xf32>
    %53 = vector.broadcast %52 : vector<1x128xf32> to vector<128x128xf32>
    %54 = arith.addf %51, %53 : vector<128x128xf32>
    %cst_34 = arith.constant 0.000000e+00 : f32
    %55 = vector.broadcast %cst_34 : f32 to vector<128x128xf32>
    %56 = arith.cmpf ogt, %54, %55 : vector<128x128xf32>
    %cst_35 = arith.constant 2.000000e-01 : f32
    %57 = vector.broadcast %cst_35 : f32 to vector<128x128xf32>
    %58 = arith.mulf %57, %54 : vector<128x128xf32>
    %59 = arith.select %56, %54, %58 : vector<128x128xi1>, vector<128x128xf32>
    %60 = arith.addf %20, %59 : vector<128x128xf32>
    %61 = vector.shape_cast %60 : vector<128x128xf32> to vector<2x64x128xf32>
    %c0_36 = arith.constant 0 : index
    %c0_37 = arith.constant 0 : index
    %c0_38 = arith.constant 0 : index
    %62 = vector.load %arg7[%c0_36, %c0_37, %c0_38] : memref<2x64x128xf32, #tpu.memory_space<vmem>>, vector<2x64x128xf32>
    tpu.vector_store %arg7[%c0_36, %c0_37, %c0_38], %61 {strides = array<i32>} : memref<2x64x128xf32, #tpu.memory_space<vmem>>, vector<2x64x128xf32>,
    return
  }
  func.func @transform_0(%arg0: i32) -> (i32, i32, i32) {
    %c0_i32 = arith.constant 0 : i32
    %c0_i32_0 = arith.constant 0 : i32
    %c0_i32_1 = arith.constant 0 : i32
    return %c0_i32, %arg0, %c0_i32_0 : i32, i32, i32
  }
  func.func @transform_1(%arg0: i32) -> (i32, i32, i32, i32) {
    %c0_i32 = arith.constant 0 : i32
    %c0_i32_0 = arith.constant 0 : i32
    %c0_i32_1 = arith.constant 0 : i32
    %c0_i32_2 = arith.constant 0 : i32
    return %arg0, %c0_i32, %c0_i32_0, %c0_i32_1 : i32, i32, i32, i32
  }
  func.func @transform_2(%arg0: i32) -> (i32, i32) {
    %c0_i32 = arith.constant 0 : i32
    %c0_i32_0 = arith.constant 0 : i32
    %c0_i32_1 = arith.constant 0 : i32
    return %c0_i32, %c0_i32_0 : i32, i32
  }
  func.func @transform_3(%arg0: i32) -> (i32, i32) {
    %c0_i32 = arith.constant 0 : i32
    %c0_i32_0 = arith.constant 0 : i32
    %c0_i32_1 = arith.constant 0 : i32
    return %c0_i32, %c0_i32_0 : i32, i32
  }
  func.func @transform_4(%arg0: i32) -> (i32, i32) {
    %c0_i32 = arith.constant 0 : i32
    %c0_i32_0 = arith.constant 0 : i32
    %c0_i32_1 = arith.constant 0 : i32
    return %c0_i32, %c0_i32_0 : i32, i32
  }
  func.func @transform_5(%arg0: i32) -> (i32, i32) {
    %c0_i32 = arith.constant 0 : i32
    %c0_i32_0 = arith.constant 0 : i32
    %c0_i32_1 = arith.constant 0 : i32
    return %c0_i32, %c0_i32_0 : i32, i32
  }
  func.func @transform_6(%arg0: i32) -> (i32, i32, i32) {
    %c0_i32 = arith.constant 0 : i32
    %c0_i32_0 = arith.constant 0 : i32
    %c0_i32_1 = arith.constant 0 : i32
    return %c0_i32, %arg0, %c0_i32_0 : i32, i32, i32
  }
}

</mosaic_0001>

<bundles_post_ra>
// kernel: resblock1dtf_forward.3
= control target key start
LH: loop header
LB: loop body
LE: loop exit
PB: predicated region body
PF: predicated region fallthrough
CT: control target
= control target key end

     0   :  { %s1330_s21 = smov 0   ;;  %s1332_s22 = smov 0   ;;  %s1913_s0 = inlined_call_operand.vmem [shape: f32[2,256,128], index: 0, kind: input, shape index: {}]   ;;  %s1914_s1 = inlined_call_operand.vmem [shape: f32[4,2,2,128], index: 1, kind: input, shape index: {}]   ;;  %s1915_s2 = inlined_call_operand.vmem [shape: f32[128,256], index: 2, kind: input, shape index: {}]   ;;  %s1916_s3 = inlined_call_operand.vmem [shape: f32[1,128], index: 3, kind: input, shape index: {}]   ;;  %s1917_s4 = inlined_call_operand.vmem [shape: f32[3,128], index: 4, kind: input, shape index: {}]   ;;  %s1918_s5 = inlined_call_operand.vmem [shape: f32[4,128], index: 5, kind: input, shape index: {}]   ;;  %s1919_s6 = inlined_call_operand.vmem [shape: f32[2,256,128], index: 6, kind: output, shape index: {}]  }
   0x1   :  { %s1334_s23 = smov 0  }
   0x2 LB: > { %s1346_s24 = sadd.s32 4294967295, %s1292_s23   ;;  %s1349_s25 = sadd.s32 1, %s1292_s23   ;;  %s1292_s23 = sphi %s1334_s23, %s1923_s23   ;;  %s1288_s22 = sphi %s1332_s22, %s1922_s22   ;;  %s1284_s21 = sphi %s1330_s21, %s1921_s21  }
   0x3   : > { %s20_s26 = ssub.s32 %s1292_s23, %s1349_s25  ;;  %s23_s27 = sadd.s32 1, %s1288_s22 }
   0x4   : > { %p21_p0 = scmp.eq.s32.totalorder %s20_s26, 0  ;;  %p30_p1 = scmp.ne.s32.totalorder %s1288_s22, %s1284_s21 }
   0x5   : > { %p31_p2 = scmp.eq.s32.totalorder %s1292_s23, 0  ;;  %p170_p3 = scmp.eq.s32.totalorder %s1346_s24, 3 }
   0x6   : > { %s1359_s28 = scalar_select %p21_p0, %s1288_s22, %s23_s27  }
   0x7   : > { %p32_p4 = por %p31_p2, %p30_p1  ;;  %p1361_p5 = por %p170_p3, %p30_p1 }
   0x8   : > { %p1175_p6 = scmp.ge.s32.totalorder %s1292_s23, 4 }
   0xa   : > { %204 = sbr.rel (%p1175_p6) target bundleno = 29 (0x1d), region = 32 }
  0x11   : > { %207 = sbr.rel (!%p32_p4) target bundleno = 29 (0x1d), region = 36  ;;  %s209_s30 = sand.u32 (%p32_p4), 1, %s1288_s22  }
  0x12   : > { %s1194_s7 = sshll.u32 (%p32_p4), %s1292_s23, 6  ;;  %s1176_s8 = sshll.u32 (%p32_p4), %s209_s30, 7 }
  0x13   : > { %s1371_s11 = scalar_lea.vmem (%p32_p4), %s1913_s0, %s1194_s7  ;;  %s211_s12 = scalar_lea.vmem (%p32_p4), [#allocation3], %s1176_s8 }
  0x14   : > { %v272_v0 = vld [vmem:[%s1371_s11] sm:$0xff] (%p32_p4)  ;;  %v274_v1 = vld [vmem:[%s1371_s11 + $0x8] sm:$0xff] (%p32_p4)  ;;  %v276_v2 = vld [vmem:[%s1371_s11 + $0x10] sm:$0xff] (%p32_p4) }
  0x15   : > { %273 = vst [vmem:[%s211_s12] sm:$0xff] (%p32_p4), %v272_v0  ;;  %275 = vst [vmem:[%s211_s12 + $0x8] sm:$0xff] (%p32_p4), %v274_v1  ;;  %v278_v3 = vld [vmem:[%s1371_s11 + $0x18] sm:$0xff] (%p32_p4)  ;;  %v280_v4 = vld [vmem:[%s1371_s11 + $0x20] sm:$0xff] (%p32_p4) }
  0x16   : > { %277 = vst [vmem:[%s211_s12 + $0x10] sm:$0xff] (%p32_p4), %v276_v2  ;;  %v282_v5 = vld [vmem:[%s1371_s11 + $0x28] sm:$0xff] (%p32_p4)  ;;  %279 = vst [vmem:[%s211_s12 + $0x18] sm:$0xff] (%p32_p4), %v278_v3  ;;  %v284_v6 = vld [vmem:[%s1371_s11 + $0x30] sm:$0xff] (%p32_p4) }
  0x17   : > { %281 = vst [vmem:[%s211_s12 + $0x20] sm:$0xff] (%p32_p4), %v280_v4  ;;  %283 = vst [vmem:[%s211_s12 + $0x28] sm:$0xff] (%p32_p4), %v282_v5  ;;  %v286_v7 = vld [vmem:[%s1371_s11 + $0x38] sm:$0xff] (%p32_p4)  ;;  %v288_v8 = vld [vmem:[%s1371_s11 + $0x100] sm:$0xff] (%p32_p4) }
  0x18   : > { %285 = vst [vmem:[%s211_s12 + $0x30] sm:$0xff] %v284_v6  ;;  %287 = vst [vmem:[%s211_s12 + $0x38] sm:$0xff] %v286_v7  ;;  %v290_v9 = vld [vmem:[%s1371_s11 + $0x108] sm:$0xff]  ;;  %v292_v10 = vld [vmem:[%s1371_s11 + $0x110] sm:$0xff] }
  0x19   : > { %289 = vst [vmem:[%s211_s12 + $0x40] sm:$0xff] %v288_v8  ;;  %v294_v11 = vld [vmem:[%s1371_s11 + $0x118] sm:$0xff]  ;;  %291 = vst [vmem:[%s211_s12 + $0x48] sm:$0xff] %v290_v9  ;;  %v296_v12 = vld [vmem:[%s1371_s11 + $0x120] sm:$0xff] }
  0x1a   : > { %293 = vst [vmem:[%s211_s12 + $0x50] sm:$0xff] %v292_v10  ;;  %295 = vst [vmem:[%s211_s12 + $0x58] sm:$0xff] %v294_v11  ;;  %v298_v13 = vld [vmem:[%s1371_s11 + $0x128] sm:$0xff]  ;;  %v300_v14 = vld [vmem:[%s1371_s11 + $0x130] sm:$0xff] }
  0x1b   : > { %297 = vst [vmem:[%s211_s12 + $0x60] sm:$0xff] %v296_v12  ;;  %299 = vst [vmem:[%s211_s12 + $0x68] sm:$0xff] %v298_v13  ;;  %v302_v15 = vld [vmem:[%s1371_s11 + $0x138] sm:$0xff] }
  0x1c   : > { %301 = vst [vmem:[%s211_s12 + $0x70] sm:$0xff] %v300_v14  ;;  %303 = vst [vmem:[%s211_s12 + $0x78] sm:$0xff] %v302_v15 }
  0x1d PF: > { %p1179_p7 = scmp.ge.s32.totalorder %s1292_s23, 1  ;;  %p316_p8 = scmp.lt.s32.totalorder %s1292_s23, 5 }
  0x1f   : > { %p317_p9 = pnand %p1179_p7, %p316_p8 }
  0x20   : > { %v380_v16 = vld [vmem:[%s1915_s2 + $0x8] sm:$0xff] (!%p317_p9)  ;;  %v382_v17 = vld [vmem:[%s1915_s2 + $0x18] sm:$0xff] (!%p317_p9)  ;;  %v379_v18 = vld [vmem:[%s1915_s2] sm:$0xff] (!%p317_p9)  ;;  %v1294_v23 = vmov (!%p317_p9), 0.0   ;;  %s323_s7 = sand.u32 (!%p317_p9), 1, %s1284_s21   ;;  %p357_p10 = scmp.lt.s32.totalorder (!%p317_p9), %s1346_s24, 3 }
  0x21   : > { %320 = sbr.rel (%p317_p9) target bundleno = 330 (0x14a), region = 78  ;;  %v1197_v19 = vpack.c.bf16 (!%p317_p9), %v382_v17, %v380_v16  ;;  %v381_v20 = vld [vmem:[%s1915_s2 + $0x10] sm:$0xff] (!%p317_p9)  ;;  %v384_v21 = vld [vmem:[%s1915_s2 + $0x28] sm:$0xff] (!%p317_p9)  ;;  %v386_v22 = vld [vmem:[%s1915_s2 + $0x38] sm:$0xff] (!%p317_p9)  ;;  %475 = vmatprep.mubr.f32.mxu0 (!%p317_p9), %v1294_v23  ;;  %523 = vmatprep.mubr.f32.mxu1 (!%p317_p9), %v1294_v23  ;;  %s1424_s21 = sshll.u32 (!%p317_p9), %s323_s7, 7 }
  0x22   : > { %v1199_v24 = vpack.c.bf16 (!%p317_p9), %v381_v20, %v379_v18  ;;  %v1201_v25 = vpack.c.bf16 (!%p317_p9), %v386_v22, %v384_v21  ;;  %v383_v26 = vld [vmem:[%s1915_s2 + $0x20] sm:$0xff] (!%p317_p9)  ;;  %v385_v27 = vld [vmem:[%s1915_s2 + $0x30] sm:$0xff] (!%p317_p9)  ;;  %v388_v28 = vld [vmem:[%s1915_s2 + $0x48] sm:$0xff] (!%p317_p9)  ;;  %s1451_s14 = scalar_lea.vmem (!%p317_p9), [#allocation3], %s1424_s21  ;;  %s1800_s30 = scalar_lea.vmem (!%p317_p9), [#allocation4], %s1424_s21 }
  0x23   : > { %1198 = vmatprep.subr.bf16.mxu0 (!%p317_p9), %v1197_v19  ;;  %1229 = vmatprep.subr.bf16.mxu1 (!%p317_p9), %v1197_v19  ;;  %v390_v29 = vld [vmem:[%s1915_s2 + $0x58] sm:$0xff] (!%p317_p9)  ;;  %v1203_v30 = vpack.c.bf16 (!%p317_p9), %v385_v27, %v383_v26  ;;  %v387_v32 = vld [vmem:[%s1915_s2 + $0x40] sm:$0xff] (!%p317_p9)  ;;  %v389_v33 = vld [vmem:[%s1915_s2 + $0x50] sm:$0xff] (!%p317_p9)  ;;  %v740_v19 = vlaneseq (!%p317_p9) }
  0x24   : > { %1200 = vmatpush1.bf16.msra.mxu0 (!%p317_p9), %v1199_v24  ;;  %1237 = vmatpush1.bf16.msra.mxu1 (!%p317_p9), %v1199_v24  ;;  %v1205_v31 = vpack.c.bf16 (!%p317_p9), %v390_v29, %v388_v28  ;;  %v392_v34 = vld [vmem:[%s1915_s2 + $0x68] sm:$0xff] (!%p317_p9)  ;;  %v394_v35 = vld [vmem:[%s1915_s2 + $0x78] sm:$0xff] (!%p317_p9)  ;;  %v1207_v36 = vpack.c.bf16 (!%p317_p9), %v389_v33, %v387_v32  ;;  %v391_v38 = vld [vmem:[%s1915_s2 + $0x60] sm:$0xff] (!%p317_p9) }
  0x25   : > { %1202 = vmatprep.subr.bf16.mxu0 (!%p317_p9), %v1201_v25  ;;  %1230 = vmatprep.subr.bf16.mxu1 (!%p317_p9), %v1201_v25  ;;  %v1209_v37 = vpack.c.bf16 (!%p317_p9), %v394_v35, %v392_v34  ;;  %v393_v39 = vld [vmem:[%s1915_s2 + $0x70] sm:$0xff] (!%p317_p9)  ;;  %v396_v40 = vld [vmem:[%s1915_s2 + $0x88] sm:$0xff] (!%p317_p9)  ;;  %v398_v41 = vld [vmem:[%s1915_s2 + $0x98] sm:$0xff] (!%p317_p9)  ;;  %v741_v20 = vshrl.u32 (!%p317_p9), %v740_v19, 7 }
  0x26   : > { %v1454_v42 = vld [vmem:[%s1451_s14] sm:$0xff] (!%p317_p9)  ;;  %v397_v44 = vld [vmem:[%s1915_s2 + $0x90] sm:$0xff] (!%p317_p9)  ;;  %v1467_v46 = vld [vmem:[%s1451_s14 + $0x8] sm:$0xff] (!%p317_p9)  ;;  %v1211_v48 = vpack.c.bf16 (!%p317_p9), %v393_v39, %v391_v38  ;;  %v1213_v54 = vpack.c.bf16 (!%p317_p9), %v398_v41, %v396_v40 }
  0x27   : > { %v395_v43 = vld [vmem:[%s1915_s2 + $0x80] sm:$0xff] (!%p317_p9)  ;;  %706 = vst [vmem:[#allocation2 + $0x8] sm:$0xff] (!%p317_p9), %v1454_v42  ;;  %v1470_v47 = vld [vmem:[%s1451_s14 + $0x48] sm:$0xff] (!%p317_p9)  ;;  %v402_v50 = vld [vmem:[%s1915_s2 + $0xb8] sm:$0xff] (!%p317_p9)  ;;  %v742_v21 = vsub.s32 (!%p317_p9), 0, %v741_v20  ;;  %v794_v22 = vsub.s32 (!%p317_p9), 1, %v741_v20 }
  0x28   : > { %1204 = vmatpush1.bf16.msra.mxu0 %v1203_v30  ;;  %1238 = vmatpush1.bf16.msra.mxu1 %v1203_v30  ;;  %v1464_v45 = vld [vmem:[%s1451_s14 + $0x40] sm:$0xff]  ;;  %v400_v49 = vld [vmem:[%s1915_s2 + $0xa8] sm:$0xff]  ;;  %707 = vst [vmem:[#allocation2 + $0x10] sm:$0xff] %v1467_v46  ;;  %715 = vst [vmem:[#allocation2 + $0x60] sm:$0xff] %v1470_v47  ;;  %v1215_v0 = vpack.c.bf16 %v397_v44, %v395_v43  ;;  %s358_s7 = scalar_select %p357_p10, %s1346_s24, 3  ;;  %v846_v26 = vsub.s32 2, %v741_v20 }
  0x29   : > { %1206 = vmatprep.subr.bf16.mxu0 %v1205_v31  ;;  %1231 = vmatprep.subr.bf16.mxu1 %v1205_v31  ;;  %714 = vst [vmem:[#allocation2 + $0x58] sm:$0xff] %v1464_v45  ;;  %v1482_v51 = vld [vmem:[%s1451_s14 + $0x10] sm:$0xff]  ;;  %v1488_v53 = vld [vmem:[%s1451_s14 + $0x18] sm:$0xff]  ;;  %v1497_v56 = vld [vmem:[%s1451_s14 + $0x20] sm:$0xff]  ;;  %v1217_v1 = vpack.c.bf16 %v402_v50, %v400_v49  ;;  %s1196_s21 = sshll.u32 (%p1361_p5), %s1346_s24, 6 }
  0x2a   : > { %v1485_v52 = vld [vmem:[%s1451_s14 + $0x50] sm:$0xff]  ;;  %708 = vst [vmem:[#allocation2 + $0x18] sm:$0xff] %v1482_v51  ;;  %709 = vst [vmem:[#allocation2 + $0x20] sm:$0xff] %v1488_v53  ;;  %v1494_v55 = vld [vmem:[%s1451_s14 + $0x58] sm:$0xff]  ;;  %s1195_s8 = sshll.u32 %s358_s7, 2  ;;  %s1011_s9 = scalar_lea.vmem (%p1361_p5), %s1919_s6, %s1196_s21 }
  0x2b   : > { %716 = vst [vmem:[#allocation2 + $0x68] sm:$0xff] %v1485_v52  ;;  %v1500_v57 = vld [vmem:[%s1451_s14 + $0x60] sm:$0xff]  ;;  %717 = vst [vmem:[#allocation2 + $0x70] sm:$0xff] %v1494_v55  ;;  %v1506_v58 = vld [vmem:[%s1451_s14 + $0x28] sm:$0xff]  ;;  %s361_s11 = scalar_lea.vmem %s1914_s1, %s1195_s8 }
  0x2c   : > { %1208 = vmatpush1.bf16.msra.mxu0 %v1207_v36  ;;  %1239 = vmatpush1.bf16.msra.mxu1 %v1207_v36  ;;  %710 = vst [vmem:[#allocation2 + $0x28] sm:$0xff] %v1497_v56  ;;  %718 = vst [vmem:[#allocation2 + $0x78] sm:$0xff] %v1500_v57  ;;  %v1509_v59 = vld [vmem:[%s1451_s14 + $0x68] sm:$0xff]  ;;  %v1512_v60 = vld [vmem:[%s1451_s14 + $0x30] sm:$0xff] }
  0x2d   : > { %1210 = vmatprep.subr.bf16.mxu0 %v1209_v37  ;;  %1232 = vmatprep.subr.bf16.mxu1 %v1209_v37  ;;  %711 = vst [vmem:[#allocation2 + $0x30] sm:$0xff] %v1506_v58  ;;  %719 = vst [vmem:[#allocation2 + $0x80] sm:$0xff] %v1509_v59  ;;  %v1518_v61 = vld [vmem:[%s1451_s14 + $0x70] sm:$0xff]  ;;  %v1521_v62 = vld [vmem:[%s1451_s14 + $0x38] sm:$0xff] }
  0x2e   : > { %712 = vst [vmem:[#allocation2 + $0x38] sm:$0xff] %v1512_v60  ;;  %v1524_v63 = vld [vmem:[%s1451_s14 + $0x78] sm:$0xff]  ;;  %720 = vst [vmem:[#allocation2 + $0x88] sm:$0xff] %v1518_v61  ;;  %v399_v2 = vld [vmem:[%s1915_s2 + $0xa0] sm:$0xff] }
  0x2f   : > { %713 = vst [vmem:[#allocation2 + $0x40] sm:$0xff] %v1521_v62  ;;  %721 = vst [vmem:[#allocation2 + $0x90] sm:$0xff] %v1524_v63  ;;  %v401_v3 = vld [vmem:[%s1915_s2 + $0xb0] sm:$0xff]  ;;  %v404_v4 = vld [vmem:[%s1915_s2 + $0xc8] sm:$0xff] }
  0x30   : > { %1212 = vmatpush1.bf16.msra.mxu0 %v1211_v48  ;;  %1240 = vmatpush1.bf16.msra.mxu1 %v1211_v48  ;;  %v406_v5 = vld [vmem:[%s1915_s2 + $0xd8] sm:$0xff]  ;;  %v1219_v6 = vpack.c.bf16 %v401_v3, %v399_v2  ;;  %v403_v8 = vld [vmem:[%s1915_s2 + $0xc0] sm:$0xff]  ;;  %v405_v9 = vld [vmem:[%s1915_s2 + $0xd0] sm:$0xff] }
  0x31   : > { %1214 = vmatprep.subr.bf16.mxu0 %v1213_v54  ;;  %1233 = vmatprep.subr.bf16.mxu1 %v1213_v54  ;;  %v1221_v7 = vpack.c.bf16 %v406_v5, %v404_v4  ;;  %v408_v10 = vld [vmem:[%s1915_s2 + $0xe8] sm:$0xff]  ;;  %v410_v11 = vld [vmem:[%s1915_s2 + $0xf8] sm:$0xff]  ;;  %v1223_v12 = vpack.c.bf16 %v405_v9, %v403_v8  ;;  %v407_v14 = vld [vmem:[%s1915_s2 + $0xe0] sm:$0xff] }
  0x32   : > { %v1225_v13 = vpack.c.bf16 %v410_v11, %v408_v10  ;;  %v409_v15 = vld [vmem:[%s1915_s2 + $0xf0] sm:$0xff]  ;;  %v702_v17 = vld [vmem:[%s361_s11] sm:$0x3]  ;;  %v703_v18 = vld [vmem:[%s361_s11 + $0x2] sm:$0x3] }
  0x33   : > { %v1227_v16 = vpack.c.bf16 %v409_v15, %v407_v14  ;;  %704 = vst [vmem:[#allocation2 + $0x7] sm:$0x1] %v702_v17  ;;  %722 = vst [vmem:[#allocation2 + $0x47] sm:$0x2] %v702_v17  ;;  %v828_v31 = vld [vmem:[#allocation2 + $0x9] sm:$0xff]  ;;  %v836_v37 = vld [vmem:[#allocation2 + $0x59] sm:$0xff] }
  0x34   : > { %1216 = vmatpush1.bf16.msra.mxu0 %v1215_v0  ;;  %1241 = vmatpush1.bf16.msra.mxu1 %v1215_v0  ;;  %705 = vst [vmem:[#allocation2 + $0x57] sm:$0x1] %v703_v18  ;;  %723 = vst [vmem:[#allocation2 + $0x97] sm:$0x2] %v703_v18  ;;  %v725_v38 = vld [vmem:[#allocation2 + $0xf] sm:$0xff]  ;;  %v733_v39 = vld [vmem:[#allocation2 + $0x5f] sm:$0xff] }
  0x35   : > { %1218 = vmatprep.subr.bf16.mxu0 %v1217_v1  ;;  %1234 = vmatprep.subr.bf16.mxu1 %v1217_v1  ;;  %v829_v50 = vld [vmem:[#allocation2 + $0x11] sm:$0xff]  ;;  %v837_v54 = vld [vmem:[#allocation2 + $0x61] sm:$0xff]  ;;  %v838_v17 = vld [vmem:[#allocation2 + $0x69] sm:$0xff] }
  0x36   : > { %v727_v8 = vld [vmem:[#allocation2 + $0x1f] sm:$0xff] }
  0x37   : > { %v831_v20 = vld [vmem:[#allocation2 + $0x21] sm:$0xff] }
  0x38   : > { %1220 = vmatpush1.bf16.msra.mxu0 %v1219_v6  ;;  %1242 = vmatpush1.bf16.msra.mxu1 %v1219_v6  ;;  %v726_v6 = vld [vmem:[#allocation2 + $0x17] sm:$0xff] }
  0x39   : > { %1222 = vmatprep.subr.bf16.mxu0 %v1221_v7  ;;  %1235 = vmatprep.subr.bf16.mxu1 %v1221_v7  ;;  %v734_v7 = vld [vmem:[#allocation2 + $0x67] sm:$0xff] }
  0x3a   : > { %v724_v27 = vld [vmem:[#allocation2 + $0x7] sm:$0xff] }
  0x3b   : > { %v732_v32 = vld [vmem:[#allocation2 + $0x57] sm:$0xff] }
  0x3c   : > { %1224 = vmatpush1.bf16.msra.mxu0 %v1223_v12  ;;  %1243 = vmatpush1.bf16.msra.mxu1 %v1223_v12 }
  0x3d   : > { %1226 = vmatprep.subr.bf16.mxu0 %v1225_v13  ;;  %1236 = vmatprep.subr.bf16.mxu1 %v1225_v13 }
  0x40   : > { %1228 = vmatpush1.bf16.msra.mxu0 %v1227_v16  ;;  %1244 = vmatpush1.bf16.msra.mxu1 %v1227_v16  ;;  %v830_v16 = vld [vmem:[#allocation2 + $0x19] sm:$0xff] }
  0x43   : > { %476 = vmatmul.mubr.f32.vlgmr.msra.gmra.mrb[0].mxu0 %v1454_v42  ;;  %524 = vmatmul.mubr.f32.vlgmr.msra.gmra.mrb[0].mxu1 %v1464_v45 }
  0x44   : > { %481 = vmatprep.mubr.f32.mxu0 %v1294_v23  ;;  %529 = vmatprep.mubr.f32.mxu1 %v1294_v23 }
  0x47   : > { %482 = vmatmul.mubr.f32.gmra.mrb[2].mxu0 %v1467_v46  ;;  %530 = vmatmul.mubr.f32.gmra.mrb[2].mxu1 %v1470_v47 }
  0x48   : > { %487 = vmatprep.mubr.f32.mxu0 %v1294_v23  ;;  %535 = vmatprep.mubr.f32.mxu1 %v1294_v23 }
  0x4b   : > { %488 = vmatmul.mubr.f32.gmra.mrb[4].mxu0 %v1482_v51  ;;  %536 = vmatmul.mubr.f32.gmra.mrb[4].mxu1 %v1485_v52 }
  0x4c   : > { %493 = vmatprep.mubr.f32.mxu0 %v1294_v23  ;;  %541 = vmatprep.mubr.f32.mxu1 %v1294_v23 }
  0x4f   : > { %494 = vmatmul.mubr.f32.gmra.mrb[6].mxu0 %v1488_v53  ;;  %542 = vmatmul.mubr.f32.gmra.mrb[6].mxu1 %v1494_v55 }
  0x50   : > { %499 = vmatprep.mubr.f32.mxu0 %v1294_v23  ;;  %547 = vmatprep.mubr.f32.mxu1 %v1294_v23 }
  0x53   : > { %500 = vmatmul.mubr.f32.gmra.mrb[8].mxu0 %v1497_v56  ;;  %548 = vmatmul.mubr.f32.gmra.mrb[8].mxu1 %v1500_v57 }
  0x54   : > { %505 = vmatprep.mubr.f32.mxu0 %v1294_v23  ;;  %553 = vmatprep.mubr.f32.mxu1 %v1294_v23 }
  0x57   : > { %506 = vmatmul.mubr.f32.gmra.mrb[10].mxu0 %v1506_v58  ;;  %554 = vmatmul.mubr.f32.gmra.mrb[10].mxu1 %v1509_v59 }
  0x58   : > { %511 = vmatprep.mubr.f32.mxu0 %v1294_v23  ;;  %559 = vmatprep.mubr.f32.mxu1 %v1294_v23 }
  0x5b   : > { %512 = vmatmul.mubr.f32.gmra.mrb[12].mxu0 %v1512_v60  ;;  %560 = vmatmul.mubr.f32.gmra.mrb[12].mxu1 %v1518_v61 }
  0x5c   : > { %517 = vmatprep.mubr.f32.mxu0 %v1294_v23  ;;  %565 = vmatprep.mubr.f32.mxu1 %v1294_v23  ;;  %v701_v23 = vld [vmem:[%s1917_s4] sm:$0x7] }
  0x5d   : > { %v1597_v24 = vrot.slane %v701_v23, %v742_v21  ;;  %v1599_v25 = vrot.slane %v701_v23, %v794_v22  ;;  %v1604_v30 = vrot.slane %v701_v23, %v846_v26  ;;  %v735_v21 = vld [vmem:[#allocation2 + $0x6f] sm:$0xff] }
  0x5f   : > { %518 = vmatmul.mubr.f32.gmra.mrb[14].mxu0 %v1521_v62  ;;  %566 = vmatmul.mubr.f32.gmra.mrb[14].mxu1 %v1524_v63  ;;  %v744_v28 = vmul.f32 %v1597_v24, %v724_v27  ;;  %v796_v29 = vmul.f32 %v1599_v25, %v1454_v42  ;;  %v848_v34 = vmul.f32 %v1604_v30, %v828_v31  ;;  %v1614_v42 = vld [vmem:[%s1918_s5 + $0x2] ss:$0 sm:$0xff]  ;;  %v736_v27 = vld [vmem:[#allocation2 + $0x77] sm:$0xff] }
  0x60   : > { %v752_v35 = vmul.f32 %v1597_v24, %v732_v32  ;;  %v804_v36 = vmul.f32 %v1599_v25, %v1464_v45  ;;  %v856_v43 = vmul.f32 %v1604_v30, %v836_v37  ;;  %v745_v44 = vmul.f32 %v1597_v24, %v725_v38  ;;  %v729_v32 = vld [vmem:[#allocation2 + $0x2f] sm:$0xff] }
  0x61   : > { %v812_v33 = vadd.f32 %v796_v29, %v744_v28  ;;  %v797_v48 = vmul.f32 %v1599_v25, %v1467_v46  ;;  %v753_v49 = vmul.f32 %v1597_v24, %v733_v39  ;;  %v805_v45 = vmul.f32 %v1599_v25, %v1470_v47  ;;  %v1628_v46 = vld [vmem:[%s1918_s5 + $0x3] ss:$0 sm:$0xff]  ;;  %v839_v38 = vld [vmem:[#allocation2 + $0x71] sm:$0xff] }
  0x62   : > { %v820_v41 = vadd.f32 %v804_v36, %v752_v35  ;;  %v849_v3 = vmul.f32 %v1604_v30, %v829_v50  ;;  %v857_v5 = vmul.f32 %v1604_v30, %v837_v54  ;;  %v746_v12 = vmul.f32 %v1597_v24, %v726_v6 }
  0x63   : > { %v864_v40 = vadd.f32 %v848_v34, %v812_v33  ;;  %v813_v2 = vadd.f32 %v797_v48, %v745_v44  ;;  %v821_v4 = vadd.f32 %v805_v45, %v753_v49  ;;  %v798_v13 = vmul.f32 %v1599_v25, %v1482_v51  ;;  %v737_v33 = vld [vmem:[#allocation2 + $0x7f] sm:$0xff]  ;;  %v832_v44 = vld [vmem:[#allocation2 + $0x29] sm:$0xff] }
  0x64   : > { %v872_v1 = vadd.f32 %v856_v43, %v820_v41  ;;  %v754_v14 = vmul.f32 %v1597_v24, %v734_v7  ;;  %v806_v15 = vmul.f32 %v1599_v25, %v1485_v52  ;;  %v747_v18 = vmul.f32 %v1597_v24, %v727_v8  ;;  %v728_v52 = vld [vmem:[#allocation2 + $0x27] sm:$0xff]  ;;  %v840_v48 = vld [vmem:[#allocation2 + $0x79] sm:$0xff] }
  0x65   : > { %v885_v0 = vmul.f32 %v1614_v42, %v864_v40  ;;  %v865_v10 = vadd.f32 %v849_v3, %v813_v2  ;;  %v873_v11 = vadd.f32 %v857_v5, %v821_v4  ;;  %v799_v19 = vmul.f32 %v1599_v25, %v1488_v53 }
  0x66   : > { %v893_v9 = vmul.f32 %v1614_v42, %v872_v1  ;;  %v814_v28 = vadd.f32 %v798_v13, %v746_v12  ;;  %v850_v29 = vmul.f32 %v1604_v30, %v830_v16  ;;  %v822_v31 = vadd.f32 %v806_v15, %v754_v14  ;;  %v841_v1 = vld [vmem:[#allocation2 + $0x81] sm:$0xff] }
  0x67   : > { %v1631_v47 = vadd.f32 %v1628_v46, %v885_v0  ;;  %v886_v51 = vmul.f32 %v1614_v42, %v865_v10  ;;  %v894_v26 = vmul.f32 %v1614_v42, %v873_v11  ;;  %v858_v53 = vmul.f32 %v1604_v30, %v838_v17 }
  0x68   : > { %v1647_v23 = vadd.f32 %v1628_v46, %v893_v9  ;;  %v815_v34 = vadd.f32 %v799_v19, %v747_v18  ;;  %v851_v35 = vmul.f32 %v1604_v30, %v831_v20  ;;  %v755_v36 = vmul.f32 %v1597_v24, %v735_v21  ;;  %v834_v19 = vld [vmem:[#allocation2 + $0x39] sm:$0xff]  ;;  %v738_v20 = vld [vmem:[#allocation2 + $0x87] sm:$0xff] }
  0x69   : > { %v1644_v22 = vmul.f32 0.2, %v1631_v47  ;;  %v807_v37 = vmul.f32 %v1599_v25, %v1494_v55  ;;  %v748_v39 = vmul.f32 %v1597_v24, %v728_v52  ;;  %v800_v40 = vmul.f32 %v1599_v25, %v1497_v56 }
  0x6a   : > { %v756_v41 = vmul.f32 %v1597_v24, %v736_v27  ;;  %v808_v43 = vmul.f32 %v1599_v25, %v1500_v57  ;;  %v749_v49 = vmul.f32 %v1597_v24, %v729_v32  ;;  %v801_v45 = vmul.f32 %v1599_v25, %v1506_v58  ;;  %v833_v57 = vld [vmem:[#allocation2 + $0x31] sm:$0xff] }
  0x6b   : > { %v757_v55 = vmul.f32 %v1597_v24, %v737_v33  ;;  %v809_v50 = vmul.f32 %v1599_v25, %v1509_v59  ;;  %vm922_vm0 = vcmp.gt.f32.partialorder %v1631_v47, 0.0  ;;  %v907_v56 = vadd.f32 %v1628_v46, %v886_v51  ;;  %v730_v58 = vld [vmem:[#allocation2 + $0x37] sm:$0xff] }
  0x6c   : > { %v915_v54 = vadd.f32 %v1628_v46, %v894_v26  ;;  %v866_v0 = vadd.f32 %v850_v29, %v814_v28  ;;  %v874_v2 = vadd.f32 %v858_v53, %v822_v31  ;;  %v867_v3 = vadd.f32 %v851_v35, %v815_v34 }
  0x6d   : > { %v823_v4 = vadd.f32 %v807_v37, %v755_v36  ;;  %v859_v5 = vmul.f32 %v1604_v30, %v839_v38  ;;  %v816_v6 = vadd.f32 %v800_v40, %v748_v39  ;;  %v852_v7 = vmul.f32 %v1604_v30, %v832_v44  ;;  %v842_v36 = vld [vmem:[#allocation2 + $0x89] sm:$0xff] }
  0x6e   : > { %v824_v8 = vadd.f32 %v808_v43, %v756_v41  ;;  %v860_v59 = vmul.f32 %v1604_v30, %v840_v48  ;;  %v817_v9 = vadd.f32 %v801_v45, %v749_v49  ;;  %v853_v10 = vmul.f32 %v1604_v30, %v833_v57 }
  0x6f   : > { %v825_v11 = vadd.f32 %v809_v50, %v757_v55  ;;  %v861_v12 = vmul.f32 %v1604_v30, %v841_v1  ;;  %v946_v13 = vmul.f32 0.2, %v1647_v23  ;;  %v939_v14 = vmul.f32 0.2, %v907_v56 }
  0x70   : > { %v750_v15 = vmul.f32 %v1597_v24, %v730_v58  ;;  %v802_v16 = vmul.f32 %v1599_v25, %v1512_v60  ;;  %vm930_vm1 = vcmp.gt.f32.partialorder %v1647_v23, 0.0  ;;  %vm923_vm2 = vcmp.gt.f32.partialorder %v907_v56, 0.0 }
  0x71   : > { %v947_v17 = vmul.f32 0.2, %v915_v54  ;;  %v887_v18 = vmul.f32 %v1614_v42, %v866_v0  ;;  %vm931_vm3 = vcmp.gt.f32.partialorder %v915_v54, 0.0  ;;  %v895_v21 = vmul.f32 %v1614_v42, %v874_v2  ;;  %v835_v2 = vld [vmem:[#allocation2 + $0x41] sm:$0xff] }
  0x72   : > { %v875_v51 = vadd.f32 %v859_v5, %v823_v4  ;;  %v868_v26 = vadd.f32 %v852_v7, %v816_v6  ;;  %v888_v52 = vmul.f32 %v1614_v42, %v867_v3  ;;  %v876_v27 = vadd.f32 %v860_v59, %v824_v8  ;;  %v843_v3 = vld [vmem:[#allocation2 + $0x91] sm:$0xff] }
  0x73   : > { %v869_v28 = vadd.f32 %v853_v10, %v817_v9  ;;  %v877_v29 = vadd.f32 %v861_v12, %v825_v11  ;;  %v818_v31 = vadd.f32 %v802_v16, %v750_v15  ;;  %v854_v60 = vmul.f32 %v1604_v30, %v834_v19 }
  0x74   : > { %v758_v53 = vmul.f32 %v1597_v24, %v738_v20  ;;  %v810_v32 = vmul.f32 %v1599_v25, %v1518_v61  ;;  %v1693_v33 = vsel %vm922_vm0, %v1631_v47, %v1644_v22  ;;  %v1698_v34 = vsel %vm930_vm1, %v1647_v23, %v946_v13  ;;  %v731_v47 = vld [vmem:[#allocation2 + $0x3f] sm:$0xff]  ;;  %v739_v22 = vld [vmem:[#allocation2 + $0x8f] sm:$0xff] }
  0x75   : > { %v1701_v35 = vsel %vm923_vm2, %v907_v56, %v939_v14  ;;  %v1704_v37 = vsel %vm931_vm3, %v915_v54, %v947_v17  ;;  %v908_v61 = vadd.f32 %v1628_v46, %v887_v18  ;;  %v896_v38 = vmul.f32 %v1614_v42, %v875_v51 }
  0x76   : > { %v889_v39 = vmul.f32 %v1614_v42, %v868_v26  ;;  %v916_v40 = vadd.f32 %v1628_v46, %v895_v21  ;;  %v909_v23 = vadd.f32 %v1628_v46, %v888_v52  ;;  %v897_v41 = vmul.f32 %v1614_v42, %v876_v27 }
  0x77   : > { %v890_v43 = vmul.f32 %v1614_v42, %v869_v28  ;;  %v898_v44 = vmul.f32 %v1614_v42, %v877_v29  ;;  %v870_v48 = vadd.f32 %v854_v60, %v818_v31  ;;  %v826_v49 = vadd.f32 %v810_v32, %v758_v53 }
  0x78   : > { %v862_v45 = vmul.f32 %v1604_v30, %v842_v36  ;;  %v751_v55 = vmul.f32 %v1597_v24, %v731_v47  ;;  %v803_v50 = vmul.f32 %v1599_v25, %v1521_v62  ;;  %v759_v56 = vmul.f32 %v1597_v24, %v739_v22  ;;  %v1767_v36 = vld [vmem:[%s1916_s3] ss:$0 sm:$0xff] }
  0x79   : > { %v811_v54 = vmul.f32 %v1599_v25, %v1524_v63  ;;  %vm924_vm4 = vcmp.gt.f32.partialorder %v908_v61, 0.0  ;;  %v940_v0 = vmul.f32 0.2, %v908_v61  ;;  %v917_v57 = vadd.f32 %v1628_v46, %v896_v38  ;;  %v1730_v25 = vld [vmem:[%s1918_s5] ss:$0 sm:$0xff] }
  0x7a   : > { %v910_v1 = vadd.f32 %v1628_v46, %v889_v39  ;;  %vm932_vm5 = vcmp.gt.f32.partialorder %v916_v40, 0.0  ;;  %v948_v4 = vmul.f32 0.2, %v916_v40  ;;  %v918_v5 = vadd.f32 %v1628_v46, %v897_v41 }
  0x7b   : > { %v911_v58 = vadd.f32 %v1628_v46, %v890_v43  ;;  %vm925_vm6 = vcmp.gt.f32.partialorder %v909_v23, 0.0  ;;  %v919_v62 = vadd.f32 %v1628_v46, %v898_v44  ;;  %v891_v24 = vmul.f32 %v1614_v42, %v870_v48 }
  0x7c   : > { %v878_v63 = vadd.f32 %v862_v45, %v826_v49  ;;  %v819_v6 = vadd.f32 %v803_v50, %v751_v55  ;;  %v855_v7 = vmul.f32 %v1604_v30, %v835_v2  ;;  %v827_v8 = vadd.f32 %v811_v54, %v759_v56 }
  0x7d   : > { %v863_v59 = vmul.f32 %v1604_v30, %v843_v3  ;;  %v941_v9 = vmul.f32 0.2, %v909_v23  ;;  %vm933_vm7 = vcmp.gt.f32.partialorder %v917_v57, 0.0  ;;  %v949_v10 = vmul.f32 0.2, %v917_v57 }
  0x7e   : > { %vm926_vm8 = vcmp.gt.f32.partialorder %v910_v1, 0.0  ;;  %v1735_v11 = vsel %vm924_vm4, %v908_v61, %v940_v0  ;;  %v942_v12 = vmul.f32 0.2, %v910_v1  ;;  %v950_v13 = vmul.f32 0.2, %v918_v5 }
  0x7f   : > { %v943_v14 = vmul.f32 0.2, %v911_v58  ;;  %vm934_vm9 = vcmp.gt.f32.partialorder %v918_v5, 0.0  ;;  %vm927_vm10 = vcmp.gt.f32.partialorder %v911_v58, 0.0  ;;  %v912_v17 = vadd.f32 %v1628_v46, %v891_v24  ;;  %v1742_v30 = vld [vmem:[%s1918_s5 + $0x1] ss:$0 sm:$0xff] }
  0x80   : > { %v899_v18 = vmul.f32 %v1614_v42, %v878_v63  ;;  %v1745_v21 = vsel %vm932_vm5, %v916_v40, %v948_v4  ;;  %v951_v51 = vmul.f32 0.2, %v919_v62  ;;  %v871_v26 = vadd.f32 %v855_v7, %v819_v6 }
  0x81   : > { %v879_v52 = vadd.f32 %v863_v59, %v827_v8  ;;  %v1750_v29 = vsel %vm925_vm6, %v909_v23, %v941_v9  ;;  %vm935_vm11 = vcmp.gt.f32.partialorder %v919_v62, 0.0  ;;  %v1753_v31 = vsel %vm933_vm7, %v917_v57, %v949_v10 }
  0x82   : > { %v1756_v60 = vsel %vm926_vm8, %v910_v1, %v942_v12  ;;  %v1759_v53 = vsel %vm934_vm9, %v918_v5, %v950_v13  ;;  %v1762_v32 = vsel %vm927_vm10, %v911_v58, %v943_v14  ;;  %v944_v22 = vmul.f32 0.2, %v912_v17 }
  0x83   : > { %v1772_v40 = vadd.f32 %v1628_v46, %v899_v18  ;;  %v1774_v43 = vsel %vm935_vm11, %v919_v62, %v951_v51  ;;  %vm928_vm12 = vcmp.gt.f32.partialorder %v912_v17, 0.0  ;;  %v892_v44 = vmul.f32 %v1614_v42, %v871_v26 }
  0x84   : > { %v900_v48 = vmul.f32 %v1614_v42, %v879_v52  ;;  %v1782_v3 = vsel %vm928_vm12, %v912_v17, %v944_v22 }
  0x85   : > { %v1785_v42 = vmul.f32 0.2, %v1772_v40  ;;  %v1793_v59 = vadd.f32 %v1628_v46, %v892_v44  ;;  %vm936_vm3 = vcmp.gt.f32.partialorder %v1772_v40, 0.0 }
  0x86   : > { %v1807_v51 = vadd.f32 %v1628_v46, %v900_v48 }
  0x87   : > { %vm929_vm10 = vcmp.gt.f32.partialorder %v1793_v59, 0.0 }
 0x116   : > { %v477_v15 = vpop.f32.mrb[0].mxu0  ;;  %v525_v16 = vpop.f32.mrb[0].mxu1 }
 0x117   : > { %v479_v19 = vpop.f32.mrb[1].mxu0  ;;  %v527_v20 = vpop.f32.mrb[1].mxu1  ;;  %v579_v55 = vadd.f32 %v1767_v36, %v477_v15  ;;  %v587_v50 = vadd.f32 %v1767_v36, %v525_v16 }
 0x118   : > { %v600_v27 = vmul.f32 %v1730_v25, %v479_v19  ;;  %v608_v28 = vmul.f32 %v1730_v25, %v527_v20 }
 0x11a   : > { %v621_v61 = vadd.f32 %v1742_v30, %v600_v27  ;;  %v629_v38 = vadd.f32 %v1742_v30, %v608_v28  ;;  %v483_v39 = vpop.f32.mrb[2].mxu0  ;;  %v531_v47 = vpop.f32.mrb[2].mxu1 }
 0x11b   : > { %v485_v23 = vpop.f32.mrb[3].mxu0  ;;  %v533_v41 = vpop.f32.mrb[3].mxu1  ;;  %v580_v6 = vadd.f32 %v1767_v36, %v483_v39 }
 0x11c   : > { %vm637_vm13 = vcmp.gt.f32.partialorder %v621_v61, 0.0  ;;  %v653_v49 = vmul.f32 0.2, %v621_v61  ;;  %vm645_vm14 = vcmp.gt.f32.partialorder %v629_v38, 0.0  ;;  %v661_v45 = vmul.f32 0.2, %v629_v38 }
 0x11d   : > { %v601_v56 = vmul.f32 %v1730_v25, %v485_v23  ;;  %v609_v54 = vmul.f32 %v1730_v25, %v533_v41 }
 0x11e   : > { %v669_v0 = vsel %vm637_vm13, %v621_v61, %v653_v49  ;;  %v677_v57 = vsel %vm645_vm14, %v629_v38, %v661_v45  ;;  %v489_v1 = vpop.f32.mrb[4].mxu0  ;;  %v537_v2 = vpop.f32.mrb[4].mxu1  ;;  %vm937_vm13 = vcmp.gt.f32.partialorder %v1807_v51, 0.0 }
 0x11f   : > { %v685_v4 = vadd.f32 %v669_v0, %v579_v55  ;;  %v693_v5 = vadd.f32 %v677_v57, %v587_v50  ;;  %v622_v58 = vadd.f32 %v1742_v30, %v601_v56  ;;  %v630_v62 = vadd.f32 %v1742_v30, %v609_v54  ;;  %v491_v24 = vpop.f32.mrb[5].mxu0  ;;  %v539_v63 = vpop.f32.mrb[5].mxu1 }
 0x120   : > { %v602_v7 = vmul.f32 %v1730_v25, %v491_v24  ;;  %v610_v8 = vmul.f32 %v1730_v25, %v539_v63 }
 0x121   : > { %v970_v9 = vadd.f32 %v1693_v33, %v685_v4  ;;  %v978_v10 = vadd.f32 %v1698_v34, %v693_v5  ;;  %vm638_vm15 = vcmp.gt.f32.partialorder %v622_v58, 0.0  ;;  %v654_v12 = vmul.f32 0.2, %v622_v58 }
 0x122   : > { %vm646_vm0 = vcmp.gt.f32.partialorder %v630_v62, 0.0  ;;  %v662_v13 = vmul.f32 0.2, %v630_v62  ;;  %v623_v14 = vadd.f32 %v1742_v30, %v602_v7  ;;  %v631_v15 = vadd.f32 %v1742_v30, %v610_v8  ;;  %v495_v16 = vpop.f32.mrb[6].mxu0  ;;  %v543_v17 = vpop.f32.mrb[6].mxu1 }
 0x123   : > { %986 = vst [vmem:[%s1800_s30] sm:$0xff] %v970_v9  ;;  %994 = vst [vmem:[%s1800_s30 + $0x40] sm:$0xff] %v978_v10  ;;  %v588_v33 = vadd.f32 %v1767_v36, %v531_v47  ;;  %v670_v18 = vsel %vm638_vm15, %v622_v58, %v654_v12  ;;  %v581_v34 = vadd.f32 %v1767_v36, %v489_v1  ;;  %v497_v19 = vpop.f32.mrb[7].mxu0  ;;  %v545_v20 = vpop.f32.mrb[7].mxu1 }
 0x124   : > { %v686_v26 = vadd.f32 %v670_v18, %v580_v6  ;;  %v678_v52 = vsel %vm646_vm0, %v630_v62, %v662_v13  ;;  %vm639_vm1 = vcmp.gt.f32.partialorder %v623_v14, 0.0  ;;  %v655_v27 = vmul.f32 0.2, %v623_v14 }
 0x125   : > { %v694_v28 = vadd.f32 %v678_v52, %v588_v33  ;;  %vm647_vm2 = vcmp.gt.f32.partialorder %v631_v15, 0.0  ;;  %v663_v61 = vmul.f32 0.2, %v631_v15  ;;  %v603_v38 = vmul.f32 %v1730_v25, %v497_v19 }
 0x126   : > { %v971_v39 = vadd.f32 %v1701_v35, %v686_v26  ;;  %v589_v47 = vadd.f32 %v1767_v36, %v537_v2  ;;  %v671_v22 = vsel %vm639_vm1, %v623_v14, %v655_v27  ;;  %v611_v46 = vmul.f32 %v1730_v25, %v545_v20  ;;  %v501_v23 = vpop.f32.mrb[8].mxu0  ;;  %v549_v41 = vpop.f32.mrb[8].mxu1 }
 0x127   : > { %v979_v44 = vadd.f32 %v1704_v37, %v694_v28  ;;  %v687_v48 = vadd.f32 %v671_v22, %v581_v34  ;;  %v679_v49 = vsel %vm647_vm2, %v631_v15, %v663_v61  ;;  %v624_v45 = vadd.f32 %v1742_v30, %v603_v38  ;;  %v503_v55 = vpop.f32.mrb[9].mxu0  ;;  %v551_v50 = vpop.f32.mrb[9].mxu1 }
 0x128   : > { %987 = vst [vmem:[%s1800_s30 + $0x8] sm:$0xff] %v971_v39  ;;  %v695_v56 = vadd.f32 %v679_v49, %v589_v47  ;;  %v582_v35 = vadd.f32 %v1767_v36, %v495_v16  ;;  %v590_v54 = vadd.f32 %v1767_v36, %v543_v17  ;;  %v632_v0 = vadd.f32 %v1742_v30, %v611_v46 }
 0x129   : > { %995 = vst [vmem:[%s1800_s30 + $0x48] sm:$0xff] %v979_v44  ;;  %v972_v37 = vadd.f32 %v1735_v11, %v687_v48  ;;  %vm640_vm4 = vcmp.gt.f32.partialorder %v624_v45, 0.0  ;;  %v656_v57 = vmul.f32 0.2, %v624_v45  ;;  %v604_v1 = vmul.f32 %v1730_v25, %v503_v55 }
 0x12a   : > { %v980_v2 = vadd.f32 %v1745_v21, %v695_v56  ;;  %vm648_vm5 = vcmp.gt.f32.partialorder %v632_v0, 0.0  ;;  %v664_v4 = vmul.f32 0.2, %v632_v0  ;;  %v612_v5 = vmul.f32 %v1730_v25, %v551_v50  ;;  %v507_v58 = vpop.f32.mrb[10].mxu0  ;;  %v555_v62 = vpop.f32.mrb[10].mxu1 }
 0x12b   : > { %988 = vst [vmem:[%s1800_s30 + $0x10] sm:$0xff] %v972_v37  ;;  %v672_v24 = vsel %vm640_vm4, %v624_v45, %v656_v57  ;;  %v583_v63 = vadd.f32 %v1767_v36, %v501_v23  ;;  %v591_v6 = vadd.f32 %v1767_v36, %v549_v41  ;;  %v625_v11 = vadd.f32 %v1742_v30, %v604_v1  ;;  %v509_v7 = vpop.f32.mrb[11].mxu0  ;;  %v557_v8 = vpop.f32.mrb[11].mxu1 }
 0x12c   : > { %996 = vst [vmem:[%s1800_s30 + $0x50] sm:$0xff] %v980_v2  ;;  %v688_v9 = vadd.f32 %v672_v24, %v582_v35  ;;  %v680_v10 = vsel %vm648_vm5, %v632_v0, %v664_v4  ;;  %v633_v21 = vadd.f32 %v1742_v30, %v612_v5  ;;  %v605_v12 = vmul.f32 %v1730_v25, %v509_v7 }
 0x12d   : > { %v696_v13 = vadd.f32 %v680_v10, %v590_v54  ;;  %vm641_vm6 = vcmp.gt.f32.partialorder %v625_v11, 0.0  ;;  %v657_v14 = vmul.f32 0.2, %v625_v11  ;;  %v613_v15 = vmul.f32 %v1730_v25, %v557_v8 }
 0x12e   : > { %v973_v16 = vadd.f32 %v1750_v29, %v688_v9  ;;  %vm649_vm7 = vcmp.gt.f32.partialorder %v633_v21, 0.0  ;;  %v665_v17 = vmul.f32 0.2, %v633_v21  ;;  %v626_v33 = vadd.f32 %v1742_v30, %v605_v12  ;;  %v513_v18 = vpop.f32.mrb[12].mxu0  ;;  %v561_v34 = vpop.f32.mrb[12].mxu1 }
 0x12f   : > { %v981_v19 = vadd.f32 %v1753_v31, %v696_v13  ;;  %v673_v20 = vsel %vm641_vm6, %v625_v11, %v657_v14  ;;  %v584_v26 = vadd.f32 %v1767_v36, %v507_v58  ;;  %v634_v52 = vadd.f32 %v1742_v30, %v613_v15  ;;  %v515_v27 = vpop.f32.mrb[13].mxu0  ;;  %v563_v28 = vpop.f32.mrb[13].mxu1 }
 0x130   : > { %989 = vst [vmem:[%s1800_s30 + $0x18] sm:$0xff] %v973_v16  ;;  %v689_v61 = vadd.f32 %v673_v20, %v583_v63  ;;  %v681_v38 = vsel %vm649_vm7, %v633_v21, %v665_v17  ;;  %vm642_vm8 = vcmp.gt.f32.partialorder %v626_v33, 0.0  ;;  %v658_v29 = vmul.f32 0.2, %v626_v33  ;;  %v1085_v20 = vld [vmem:[%s1800_s30 + $0x40] sm:$0xff] (%p1361_p5) }
 0x131   : > { %997 = vst [vmem:[%s1800_s30 + $0x58] sm:$0xff] %v981_v19  ;;  %v697_v39 = vadd.f32 %v681_v38, %v591_v6  ;;  %v592_v47 = vadd.f32 %v1767_v36, %v555_v62  ;;  %vm650_vm9 = vcmp.gt.f32.partialorder %v634_v52, 0.0  ;;  %v666_v22 = vmul.f32 0.2, %v634_v52  ;;  %1086 = vst [vmem:[%s1011_s9 + $0x100] sm:$0xff] (%p1361_p5), %v1085_v20 }
 0x132   : > { %v974_v31 = vadd.f32 %v1756_v60, %v689_v61  ;;  %v674_v46 = vsel %vm642_vm8, %v626_v33, %v658_v29  ;;  %v606_v23 = vmul.f32 %v1730_v25, %v515_v27  ;;  %v614_v41 = vmul.f32 %v1730_v25, %v563_v28  ;;  %v519_v44 = vpop.f32.mrb[14].mxu0  ;;  %v567_v48 = vpop.f32.mrb[14].mxu1 }
 0x133   : > { %v982_v49 = vadd.f32 %v1759_v53, %v697_v39  ;;  %v690_v45 = vadd.f32 %v674_v46, %v584_v26  ;;  %v682_v55 = vsel %vm650_vm9, %v634_v52, %v666_v22  ;;  %v968_v50 = vsel %vm936_vm3, %v1772_v40, %v1785_v42  ;;  %v521_v56 = vpop.f32.mrb[15].mxu0  ;;  %v569_v60 = vpop.f32.mrb[15].mxu1  ;;  %v1087_v26 = vld [vmem:[%s1800_s30 + $0x48] sm:$0xff] (%p1361_p5)  ;;  %v1089_v52 = vld [vmem:[%s1800_s30 + $0x50] sm:$0xff] (%p1361_p5) }
 0x134   : > { %990 = vst [vmem:[%s1800_s30 + $0x20] sm:$0xff] %v974_v31  ;;  %v698_v35 = vadd.f32 %v682_v55, %v592_v47  ;;  %v627_v54 = vadd.f32 %v1742_v30, %v606_v23  ;;  %v635_v0 = vadd.f32 %v1742_v30, %v614_v41  ;;  %v607_v37 = vmul.f32 %v1730_v25, %v521_v56 }
 0x135   : > { %998 = vst [vmem:[%s1800_s30 + $0x60] sm:$0xff] %v982_v49  ;;  %v975_v53 = vadd.f32 %v1762_v32, %v690_v45  ;;  %v945_v57 = vmul.f32 0.2, %v1793_v59  ;;  %v615_v40 = vmul.f32 %v1730_v25, %v569_v60  ;;  %v585_v2 = vadd.f32 %v1767_v36, %v513_v18  ;;  %1088 = vst [vmem:[%s1011_s9 + $0x108] sm:$0xff] (%p1361_p5), %v1087_v26 }
 0x136   : > { %v983_v42 = vadd.f32 %v1774_v43, %v698_v35  ;;  %vm643_vm11 = vcmp.gt.f32.partialorder %v627_v54, 0.0  ;;  %v659_v1 = vmul.f32 0.2, %v627_v54  ;;  %vm651_vm12 = vcmp.gt.f32.partialorder %v635_v0, 0.0  ;;  %1090 = vst [vmem:[%s1011_s9 + $0x110] sm:$0xff] (%p1361_p5), %v1089_v52 }
 0x137   : > { %991 = vst [vmem:[%s1800_s30 + $0x28] sm:$0xff] %v975_v53  ;;  %v667_v4 = vmul.f32 0.2, %v635_v0  ;;  %v628_v5 = vadd.f32 %v1742_v30, %v607_v37  ;;  %v636_v58 = vadd.f32 %v1742_v30, %v615_v40  ;;  %v593_v32 = vadd.f32 %v1767_v36, %v561_v34 }
 0x138   : > { %999 = vst [vmem:[%s1800_s30 + $0x68] sm:$0xff] %v983_v42  ;;  %v675_v62 = vsel %vm643_vm11, %v627_v54, %v659_v1  ;;  %v953_v25 = vmul.f32 0.2, %v1807_v51  ;;  %v586_v11 = vadd.f32 %v1767_v36, %v519_v44  ;;  %v594_v8 = vadd.f32 %v1767_v36, %v567_v48  ;;  %v1069_v36 = vld [vmem:[%s1800_s30] sm:$0xff] (%p1361_p5)  ;;  %v1091_v27 = vld [vmem:[%s1800_s30 + $0x58] sm:$0xff] (%p1361_p5) }
 0x139   : > { %v691_v43 = vadd.f32 %v675_v62, %v585_v2  ;;  %v683_v24 = vsel %vm651_vm12, %v635_v0, %v667_v4  ;;  %vm644_vm14 = vcmp.gt.f32.partialorder %v628_v5, 0.0  ;;  %v660_v63 = vmul.f32 0.2, %v628_v5  ;;  %1070 = vst [vmem:[%s1011_s9] sm:$0xff] (%p1361_p5), %v1069_v36  ;;  %1092 = vst [vmem:[%s1011_s9 + $0x118] sm:$0xff] (%p1361_p5), %v1091_v27 }
 0x13a   : > { %v699_v6 = vadd.f32 %v683_v24, %v593_v32  ;;  %vm652_vm15 = vcmp.gt.f32.partialorder %v636_v58, 0.0  ;;  %v668_v30 = vmul.f32 0.2, %v636_v58  ;;  %v961_v10 = vsel %vm929_vm10, %v1793_v59, %v945_v57  ;;  %v1073_v59 = vld [vmem:[%s1800_s30 + $0x10] sm:$0xff] (%p1361_p5) }
 0x13b   : > { %v976_v7 = vadd.f32 %v1782_v3, %v691_v43  ;;  %v676_v9 = vsel %vm644_vm14, %v628_v5, %v660_v63  ;;  %v969_v14 = vsel %vm937_vm13, %v1807_v51, %v953_v25  ;;  %1008 = sbr.rel (!%p1361_p5) target bundleno = 330 (0x14a), region = 86  ;;  %v1071_v3 = vld [vmem:[%s1800_s30 + $0x8] sm:$0xff] (%p1361_p5)  ;;  %v1075_v51 = vld [vmem:[%s1800_s30 + $0x18] sm:$0xff] (%p1361_p5)  ;;  %v1077_v33 = vld [vmem:[%s1800_s30 + $0x20] sm:$0xff] (%p1361_p5)  ;;  %1074 = vst [vmem:[%s1011_s9 + $0x10] sm:$0xff] (%p1361_p5), %v1073_v59 }
 0x13c   : > { %v984_v21 = vadd.f32 %v968_v50, %v699_v6  ;;  %v692_v12 = vadd.f32 %v676_v9, %v586_v11  ;;  %v684_v13 = vsel %vm652_vm15, %v636_v58, %v668_v30  ;;  %1072 = vst [vmem:[%s1011_s9 + $0x8] sm:$0xff] (%p1361_p5), %v1071_v3  ;;  %1076 = vst [vmem:[%s1011_s9 + $0x18] sm:$0xff] (%p1361_p5), %v1075_v51  ;;  %v1093_v28 = vld [vmem:[%s1800_s30 + $0x60] sm:$0xff] (%p1361_p5) }
 0x13d   : > { %992 = vst [vmem:[%s1800_s30 + $0x30] sm:$0xff] %v976_v7  ;;  %v700_v15 = vadd.f32 %v684_v13, %v594_v8  ;;  %1078 = vst [vmem:[%s1011_s9 + $0x20] sm:$0xff] (%p1361_p5), %v1077_v33 }
 0x13e   : > { %1000 = vst [vmem:[%s1800_s30 + $0x70] sm:$0xff] %v984_v21  ;;  %v977_v16 = vadd.f32 %v961_v10, %v692_v12  ;;  %v1079_v18 = vld [vmem:[%s1800_s30 + $0x28] sm:$0xff] (%p1361_p5)  ;;  %1094 = vst [vmem:[%s1011_s9 + $0x120] sm:$0xff] (%p1361_p5), %v1093_v28 }
 0x13f   : > { %v985_v17 = vadd.f32 %v969_v14, %v700_v15  ;;  %1080 = vst [vmem:[%s1011_s9 + $0x28] sm:$0xff] (%p1361_p5), %v1079_v18  ;;  %v1095_v61 = vld [vmem:[%s1800_s30 + $0x68] sm:$0xff] (%p1361_p5) }
 0x140   : > { %993 = vst [vmem:[%s1800_s30 + $0x38] sm:$0xff] %v977_v16  ;;  %1096 = vst [vmem:[%s1011_s9 + $0x128] sm:$0xff] (%p1361_p5), %v1095_v61 }
 0x141   : > { %1001 = vst [vmem:[%s1800_s30 + $0x78] sm:$0xff] %v985_v17 }
 0x144   : > { %v1081_v34 = vld [vmem:[%s1800_s30 + $0x30] sm:$0xff] }
 0x145   : > { %1082 = vst [vmem:[%s1011_s9 + $0x30] sm:$0xff] %v1081_v34  ;;  %v1097_v38 = vld [vmem:[%s1800_s30 + $0x70] sm:$0xff] }
 0x146   : > { %1098 = vst [vmem:[%s1011_s9 + $0x130] sm:$0xff] %v1097_v38 }
 0x147   : > { %v1083_v19 = vld [vmem:[%s1800_s30 + $0x38] sm:$0xff] }
 0x148   : > { %1084 = vst [vmem:[%s1011_s9 + $0x38] sm:$0xff] %v1083_v19  ;;  %v1099_v29 = vld [vmem:[%s1800_s30 + $0x78] sm:$0xff] }
 0x149   : > { %1100 = vst [vmem:[%s1011_s9 + $0x138] sm:$0xff] %v1099_v29 }
 0x14a PF: > { %p13_p11 = scmp.ge.s32.totalorder %s1349_s25, 6   ;;  %s1921_s21 = smov %s1288_s22 }
 0x14b   : > { %s1922_s22 = smov %s1359_s28  ;;  %s1923_s23 = smov %s1349_s25 }
 0x14c   :  { %15 = sbr.rel (!%p13_p11) target bundleno = 2 (0x2), region = 158 }

// kernel: resblock1dtf_forward.2
= control target key start
LH: loop header
LB: loop body
LE: loop exit
PB: predicated region body
PF: predicated region fallthrough
CT: control target
= control target key end

     0   :  { %s1133_s18 = smov 0   ;;  %s1135_s19 = smov 0   ;;  %s1521_s0 = inlined_call_operand.vmem [shape: f32[2,256,128], index: 0, kind: input, shape index: {}]   ;;  %s1522_s1 = inlined_call_operand.vmem [shape: f32[4,2,2,128], index: 1, kind: input, shape index: {}]   ;;  %s1523_s2 = inlined_call_operand.vmem [shape: f32[128,128], index: 2, kind: input, shape index: {}]   ;;  %s1524_s3 = inlined_call_operand.vmem [shape: f32[3,128], index: 3, kind: input, shape index: {}]   ;;  %s1525_s4 = inlined_call_operand.vmem [shape: f32[4,128], index: 4, kind: input, shape index: {}]   ;;  %s1526_s5 = inlined_call_operand.vmem [shape: f32[4,128], index: 5, kind: output, shape index: {}]  }
   0x1   :  { %s1137_s20 = smov 0  }
   0x2 LB: > { %s1149_s21 = sadd.s32 4294967295, %s1100_s20   ;;  %s1152_s22 = sadd.s32 1, %s1100_s20   ;;  %s1100_s20 = sphi %s1137_s20, %s1529_s20   ;;  %s1096_s19 = sphi %s1135_s19, %s1528_s19   ;;  %s1092_s18 = sphi %s1133_s18, %s1527_s18  }
   0x3   : > { %s19_s23 = ssub.s32 %s1100_s20, %s1152_s22  ;;  %s22_s24 = sadd.s32 1, %s1096_s19 }
   0x4   : > { %p20_p0 = scmp.eq.s32.totalorder %s19_s23, 0  ;;  %p29_p1 = scmp.ne.s32.totalorder %s1096_s19, %s1092_s18 }
   0x5   : > { %p30_p2 = scmp.eq.s32.totalorder %s1100_s20, 0  ;;  %p901_p4 = scmp.ge.s32.totalorder %s1100_s20, 4 }
   0x6   : > { %s1161_s25 = scalar_select %p20_p0, %s1096_s19, %s22_s24  }
   0x7   : > { %p31_p3 = por %p30_p2, %p29_p1  ;;  %174 = sbr.rel (%p901_p4) target bundleno = 26 (0x1a), region = 28 }
   0xe   : > { %177 = sbr.rel (!%p31_p3) target bundleno = 26 (0x1a), region = 32  ;;  %s179_s26 = sand.u32 (%p31_p3), 1, %s1096_s19  }
   0xf   : > { %s913_s27 = sshll.u32 (%p31_p3), %s1100_s20, 6  ;;  %s902_s28 = sshll.u32 (%p31_p3), %s179_s26, 7 }
  0x10   : > { %s1169_s6 = scalar_lea.vmem (%p31_p3), %s1521_s0, %s913_s27  ;;  %s181_s7 = scalar_lea.vmem (%p31_p3), [#allocation3], %s902_s28 }
  0x11   : > { %v242_v0 = vld [vmem:[%s1169_s6] sm:$0xff] (%p31_p3)  ;;  %v244_v1 = vld [vmem:[%s1169_s6 + $0x8] sm:$0xff] (%p31_p3)  ;;  %v246_v2 = vld [vmem:[%s1169_s6 + $0x10] sm:$0xff] (%p31_p3) }
  0x12   : > { %243 = vst [vmem:[%s181_s7] sm:$0xff] (%p31_p3), %v242_v0  ;;  %245 = vst [vmem:[%s181_s7 + $0x8] sm:$0xff] (%p31_p3), %v244_v1  ;;  %v248_v3 = vld [vmem:[%s1169_s6 + $0x18] sm:$0xff] (%p31_p3)  ;;  %v250_v4 = vld [vmem:[%s1169_s6 + $0x20] sm:$0xff] (%p31_p3) }
  0x13   : > { %247 = vst [vmem:[%s181_s7 + $0x10] sm:$0xff] (%p31_p3), %v246_v2  ;;  %v252_v5 = vld [vmem:[%s1169_s6 + $0x28] sm:$0xff] (%p31_p3)  ;;  %249 = vst [vmem:[%s181_s7 + $0x18] sm:$0xff] (%p31_p3), %v248_v3  ;;  %v254_v6 = vld [vmem:[%s1169_s6 + $0x30] sm:$0xff] (%p31_p3) }
  0x14   : > { %251 = vst [vmem:[%s181_s7 + $0x20] sm:$0xff] (%p31_p3), %v250_v4  ;;  %253 = vst [vmem:[%s181_s7 + $0x28] sm:$0xff] (%p31_p3), %v252_v5  ;;  %v256_v7 = vld [vmem:[%s1169_s6 + $0x38] sm:$0xff] (%p31_p3)  ;;  %v258_v8 = vld [vmem:[%s1169_s6 + $0x100] sm:$0xff] (%p31_p3) }
  0x15   : > { %255 = vst [vmem:[%s181_s7 + $0x30] sm:$0xff] %v254_v6  ;;  %257 = vst [vmem:[%s181_s7 + $0x38] sm:$0xff] %v256_v7  ;;  %v260_v9 = vld [vmem:[%s1169_s6 + $0x108] sm:$0xff]  ;;  %v262_v10 = vld [vmem:[%s1169_s6 + $0x110] sm:$0xff] }
  0x16   : > { %259 = vst [vmem:[%s181_s7 + $0x40] sm:$0xff] %v258_v8  ;;  %v264_v11 = vld [vmem:[%s1169_s6 + $0x118] sm:$0xff]  ;;  %261 = vst [vmem:[%s181_s7 + $0x48] sm:$0xff] %v260_v9  ;;  %v266_v12 = vld [vmem:[%s1169_s6 + $0x120] sm:$0xff] }
  0x17   : > { %263 = vst [vmem:[%s181_s7 + $0x50] sm:$0xff] %v262_v10  ;;  %265 = vst [vmem:[%s181_s7 + $0x58] sm:$0xff] %v264_v11  ;;  %v268_v13 = vld [vmem:[%s1169_s6 + $0x128] sm:$0xff]  ;;  %v270_v14 = vld [vmem:[%s1169_s6 + $0x130] sm:$0xff] }
  0x18   : > { %267 = vst [vmem:[%s181_s7 + $0x60] sm:$0xff] %v266_v12  ;;  %269 = vst [vmem:[%s181_s7 + $0x68] sm:$0xff] %v268_v13  ;;  %v272_v15 = vld [vmem:[%s1169_s6 + $0x138] sm:$0xff] }
  0x19   : > { %271 = vst [vmem:[%s181_s7 + $0x70] sm:$0xff] %v270_v14  ;;  %273 = vst [vmem:[%s181_s7 + $0x78] sm:$0xff] %v272_v15 }
  0x1a PF: > { %p905_p5 = scmp.ge.s32.totalorder %s1100_s20, 1  ;;  %p286_p6 = scmp.lt.s32.totalorder %s1100_s20, 5 }
  0x1c   : > { %p287_p7 = pnand %p905_p5, %p286_p6 }
  0x1d   : > { %s293_s8 = sand.u32 (!%p287_p7), 1, %s1092_s18   ;;  %p321_p8 = scmp.lt.s32.totalorder (!%p287_p7), %s1149_s21, 3 }
  0x1e   : > { %290 = sbr.rel (%p287_p7) target bundleno = 383 (0x17f), region = 74  ;;  %s906_s9 = sshll.u32 (!%p287_p7), %s293_s8, 7 }
  0x1f   : > { %s1197_s15 = scalar_lea.vmem (!%p287_p7), [#allocation3], %s906_s9  ;;  %p909_p9 = scmp.ne.s32.totalorder (!%p287_p7), %s1149_s21, 0 }
  0x25   : > { %s322_s10 = scalar_select %p321_p8, %s1149_s21, 3 }
  0x26   : > { %329 = sbr.rel (%p909_p9) target bundleno = 45 (0x2d), region = 82  ;;  %v1102_v16 = vmov (!%p909_p9), 0.0  }
  0x27   : > { %s914_s11 = sshll.u32 %s322_s10, 2  ;;  %330 = vst [vmem:[%s1526_s5] sm:$0xf] (!%p909_p9), %v1102_v16 }
  0x28   : > { %s1195_s14 = scalar_lea.vmem %s1522_s1, %s914_s11 }
  0x2d PF: > { %v347_v17 = vld [vmem:[%s1523_s2] sm:$0xff]  ;;  %v348_v18 = vld [vmem:[%s1523_s2 + $0x8] sm:$0xff]  ;;  %v349_v19 = vld [vmem:[%s1523_s2 + $0x10] sm:$0xff]  ;;  %v547_v20 = vlaneseq  ;;  %p910_p10 = scmp.ne.s32.totalorder %s1149_s21, 3 }
  0x2e   : > { %v1003_v21 = vpack.c.bf16 %v348_v18, %v347_v17  ;;  %v350_v22 = vld [vmem:[%s1523_s2 + $0x18] sm:$0xff]  ;;  %v351_v24 = vld [vmem:[%s1523_s2 + $0x20] sm:$0xff]  ;;  %v352_v25 = vld [vmem:[%s1523_s2 + $0x28] sm:$0xff] }
  0x2f   : > { %v1007_v23 = vpack.c.bf16 %v350_v22, %v349_v19  ;;  %v548_v26 = vshrl.u32 %v547_v20, 7  ;;  %v353_v27 = vld [vmem:[%s1523_s2 + $0x30] sm:$0xff]  ;;  %v354_v28 = vld [vmem:[%s1523_s2 + $0x38] sm:$0xff]  ;;  %v355_v29 = vld [vmem:[%s1523_s2 + $0x40] sm:$0xff]  ;;  %v1011_v36 = vpack.c.bf16 %v352_v25, %v351_v24 }
  0x30   : > { %1004 = vmatprep.subr.bf16.mxu0 %v1003_v21  ;;  %1035 = vmatprep.subr.bf16.mxu1 %v1003_v21  ;;  %v356_v30 = vld [vmem:[%s1523_s2 + $0x48] sm:$0xff]  ;;  %v357_v31 = vld [vmem:[%s1523_s2 + $0x50] sm:$0xff]  ;;  %v358_v32 = vld [vmem:[%s1523_s2 + $0x58] sm:$0xff]  ;;  %v1275_v50 = vpack.c.bf16 %v354_v28, %v353_v27 }
  0x31   : > { %1006 = vmatpush3.bf16.msra.mxu0 %v1003_v21  ;;  %1043 = vmatpush3.bf16.msra.mxu1 %v1003_v21  ;;  %v359_v33 = vld [vmem:[%s1523_s2 + $0x60] sm:$0xff]  ;;  %v360_v34 = vld [vmem:[%s1523_s2 + $0x68] sm:$0xff]  ;;  %v601_v35 = vsub.s32 1, %v548_v26  ;;  %v361_v37 = vld [vmem:[%s1523_s2 + $0x70] sm:$0xff]  ;;  %v549_v42 = vsub.s32 0, %v548_v26  ;;  %v653_v45 = vsub.s32 2, %v548_v26  ;;  %v1287_v54 = vpack.c.bf16 %v356_v30, %v355_v29 }
  0x32   : > { %1008 = vmatprep.subr.bf16.mxu0 %v1007_v23  ;;  %1036 = vmatprep.subr.bf16.mxu1 %v1007_v23  ;;  %v362_v38 = vld [vmem:[%s1523_s2 + $0x78] sm:$0xff]  ;;  %v331_v39 = vld [vmem:[%s1197_s15] sm:$0xff]  ;;  %v1259_v44 = vld [vmem:[%s1197_s15 + $0x8] sm:$0xff]  ;;  %v1289_v55 = vpack.c.bf16 %v358_v32, %v357_v31  ;;  %v1291_v56 = vpack.c.bf16 %v360_v34, %v359_v33 }
  0x33   : > { %v508_v40 = vld [vmem:[%s1524_s3] sm:$0x7]  ;;  %979 = vmatprep.mubr.f32.mxu0 %v331_v39  ;;  %513 = vst [vmem:[#allocation2 + $0x8] sm:$0xff] %v331_v39  ;;  %v1262_v46 = vld [vmem:[%s1197_s15 + $0x10] sm:$0xff]  ;;  %514 = vst [vmem:[#allocation2 + $0x10] sm:$0xff] %v1259_v44  ;;  %v1302_v60 = vpack.c.bf16 %v362_v38, %v361_v37 }
  0x34   : > { %v509_v41 = vld [vmem:[%s1195_s14] sm:$0x3]  ;;  %v1256_v43 = vrot.slane %v508_v40, %v601_v35  ;;  %515 = vst [vmem:[#allocation2 + $0x18] sm:$0xff] %v1262_v46  ;;  %v1267_v47 = vld [vmem:[%s1197_s15 + $0x18] sm:$0xff]  ;;  %v1273_v49 = vld [vmem:[%s1197_s15 + $0x28] sm:$0xff]  ;;  %v1304_v61 = vrot.slane %v508_v40, %v549_v42  ;;  %v1307_v63 = vrot.slane %v508_v40, %v653_v45 }
  0x35   : > { %511 = vst [vmem:[#allocation2 + $0x7] sm:$0x1] %v509_v41  ;;  %529 = vst [vmem:[#allocation2 + $0x47] sm:$0x2] %v509_v41  ;;  %v1270_v48 = vld [vmem:[%s1197_s15 + $0x20] sm:$0xff]  ;;  %1010 = vmatpush3.bf16.msra.mxu0 %v1007_v23  ;;  %1044 = vmatpush3.bf16.msra.mxu1 %v1007_v23  ;;  %v1281_v51 = vld [vmem:[%s1197_s15 + $0x30] sm:$0xff] }
  0x36   : > { %516 = vst [vmem:[#allocation2 + $0x20] sm:$0xff] %v1267_v47  ;;  %517 = vst [vmem:[#allocation2 + $0x28] sm:$0xff] %v1270_v48  ;;  %v1284_v52 = vld [vmem:[%s1197_s15 + $0x38] sm:$0xff]  ;;  %v339_v53 = vld [vmem:[%s1197_s15 + $0x40] sm:$0xff]  ;;  %1012 = vmatprep.subr.bf16.mxu0 %v1011_v36  ;;  %1037 = vmatprep.subr.bf16.mxu1 %v1011_v36  ;;  %v603_v62 = vmul.f32 %v1256_v43, %v331_v39  ;;  %v604_v3 = vmul.f32 %v1256_v43, %v1259_v44 }
  0x37   : > { %518 = vst [vmem:[#allocation2 + $0x30] sm:$0xff] %v1273_v49  ;;  %519 = vst [vmem:[#allocation2 + $0x38] sm:$0xff] %v1281_v51  ;;  %v510_v57 = vld [vmem:[%s1195_s14 + $0x2] sm:$0x3]  ;;  %v1297_v58 = vld [vmem:[%s1197_s15 + $0x48] sm:$0xff]  ;;  %991 = vmatprep.mubr.f32.mxu1 %v339_v53  ;;  %v605_v4 = vmul.f32 %v1256_v43, %v1262_v46  ;;  %v606_v5 = vmul.f32 %v1256_v43, %v1267_v47  ;;  %v607_v6 = vmul.f32 %v1256_v43, %v1270_v48 }
  0x38   : > { %520 = vst [vmem:[#allocation2 + $0x40] sm:$0xff] %v1284_v52  ;;  %521 = vst [vmem:[#allocation2 + $0x58] sm:$0xff] %v339_v53  ;;  %v1300_v59 = vld [vmem:[%s1197_s15 + $0x50] sm:$0xff]  ;;  %v1312_v0 = vld [vmem:[%s1197_s15 + $0x58] sm:$0xff]  ;;  %v1339_v9 = vmul.f32 %v1256_v43, %v1273_v49  ;;  %v1343_v10 = vmul.f32 %v1256_v43, %v1281_v51  ;;  %v1347_v11 = vmul.f32 %v1256_v43, %v1284_v52 }
  0x39   : > { %512 = vst [vmem:[#allocation2 + $0x57] sm:$0x1] %v510_v57  ;;  %530 = vst [vmem:[#allocation2 + $0x97] sm:$0x2] %v510_v57  ;;  %v1315_v1 = vld [vmem:[%s1197_s15 + $0x60] sm:$0xff]  ;;  %v1318_v2 = vld [vmem:[%s1197_s15 + $0x68] sm:$0xff]  ;;  %1014 = vmatpush3.bf16.msra.mxu0 %v1011_v36  ;;  %1045 = vmatpush3.bf16.msra.mxu1 %v1011_v36  ;;  %v1354_v12 = vmul.f32 %v1256_v43, %v339_v53  ;;  %v1358_v13 = vmul.f32 %v1256_v43, %v1297_v58 }
  0x3a   : > { %522 = vst [vmem:[#allocation2 + $0x60] sm:$0xff] %v1297_v58  ;;  %523 = vst [vmem:[#allocation2 + $0x68] sm:$0xff] %v1300_v59  ;;  %v1332_v7 = vld [vmem:[%s1197_s15 + $0x70] sm:$0xff]  ;;  %v1335_v8 = vld [vmem:[%s1197_s15 + $0x78] sm:$0xff]  ;;  %1016 = vmatprep.subr.bf16.mxu0 %v1275_v50  ;;  %1038 = vmatprep.subr.bf16.mxu1 %v1275_v50  ;;  %v1362_v14 = vmul.f32 %v1256_v43, %v1300_v59  ;;  %v1366_v18 = vmul.f32 %v1256_v43, %v1312_v0 }
  0x3b   : > { %524 = vst [vmem:[#allocation2 + $0x70] sm:$0xff] %v1312_v0  ;;  %525 = vst [vmem:[#allocation2 + $0x78] sm:$0xff] %v1315_v1  ;;  %v532_v16 = vld [vmem:[#allocation2 + $0xf] sm:$0xff]  ;;  %v1370_v19 = vmul.f32 %v1256_v43, %v1315_v1  ;;  %v1374_v20 = vmul.f32 %v1256_v43, %v1318_v2  ;;  %v1378_v21 = vmul.f32 %v1256_v43, %v1332_v7  ;;  %v533_v25 = vld [vmem:[#allocation2 + $0x17] sm:$0xff] }
  0x3c   : > { %526 = vst [vmem:[#allocation2 + $0x80] sm:$0xff] %v1318_v2  ;;  %527 = vst [vmem:[#allocation2 + $0x88] sm:$0xff] %v1332_v7  ;;  %v531_v15 = vld [vmem:[#allocation2 + $0x7] sm:$0xff]  ;;  %v552_v23 = vmul.f32 %v1304_v61, %v532_v16  ;;  %v636_v26 = vld [vmem:[#allocation2 + $0x11] sm:$0xff]  ;;  %v1385_v28 = vmul.f32 %v1256_v43, %v1335_v8  ;;  %v553_v29 = vmul.f32 %v1304_v61, %v533_v25 }
  0x3d   : > { %528 = vst [vmem:[#allocation2 + $0x90] sm:$0xff] %v1335_v8  ;;  %v635_v17 = vld [vmem:[#allocation2 + $0x9] sm:$0xff]  ;;  %v551_v22 = vmul.f32 %v1304_v61, %v531_v15  ;;  %v534_v27 = vld [vmem:[#allocation2 + $0x1f] sm:$0xff]  ;;  %1018 = vmatpush3.bf16.msra.mxu0 %v1275_v50  ;;  %1046 = vmatpush3.bf16.msra.mxu1 %v1275_v50  ;;  %v656_v30 = vmul.f32 %v1307_v63, %v636_v26 }
  0x3e   : > { %v655_v24 = vmul.f32 %v1307_v63, %v635_v17  ;;  %v554_v31 = vmul.f32 %v1304_v61, %v534_v27  ;;  %v637_v32 = vld [vmem:[#allocation2 + $0x19] sm:$0xff]  ;;  %v535_v33 = vld [vmem:[#allocation2 + $0x27] sm:$0xff]  ;;  %1020 = vmatprep.subr.bf16.mxu0 %v1287_v54  ;;  %1039 = vmatprep.subr.bf16.mxu1 %v1287_v54  ;;  %v620_v36 = vadd.f32 %v604_v3, %v552_v23  ;;  %v536_v38 = vld [vmem:[#allocation2 + $0x2f] sm:$0xff] }
  0x3f   : > { %v638_v34 = vld [vmem:[#allocation2 + $0x21] sm:$0xff]  ;;  %v619_v35 = vadd.f32 %v603_v62, %v551_v22  ;;  %v657_v37 = vmul.f32 %v1307_v63, %v637_v32  ;;  %v639_v39 = vld [vmem:[#allocation2 + $0x29] sm:$0xff]  ;;  %v621_v40 = vadd.f32 %v605_v4, %v553_v29  ;;  %v555_v42 = vmul.f32 %v1304_v61, %v535_v33  ;;  %v537_v16 = vld [vmem:[#allocation2 + $0x37] sm:$0xff] }
  0x40   : > { %v622_v41 = vadd.f32 %v606_v5, %v554_v31  ;;  %v658_v43 = vmul.f32 %v1307_v63, %v638_v34  ;;  %v672_v50 = vadd.f32 %v656_v30, %v620_v36  ;;  %v556_v53 = vmul.f32 %v1304_v61, %v536_v38  ;;  %v640_v4 = vld [vmem:[#allocation2 + $0x31] sm:$0xff]  ;;  %v538_v23 = vld [vmem:[#allocation2 + $0x3f] sm:$0xff] }
  0x41   : > { %v671_v45 = vadd.f32 %v655_v24, %v619_v35  ;;  %v659_v57 = vmul.f32 %v1307_v63, %v639_v39  ;;  %1022 = vmatpush3.bf16.msra.mxu0 %v1287_v54  ;;  %1047 = vmatpush3.bf16.msra.mxu1 %v1287_v54  ;;  %v673_v62 = vadd.f32 %v657_v37, %v621_v40  ;;  %v641_v24 = vld [vmem:[#allocation2 + $0x39] sm:$0xff]  ;;  %v642_v32 = vld [vmem:[#allocation2 + $0x41] sm:$0xff] }
  0x42   : > { %v623_v3 = vadd.f32 %v607_v6, %v555_v42  ;;  %v674_v15 = vadd.f32 %v658_v43, %v622_v41  ;;  %1024 = vmatprep.subr.bf16.mxu0 %v1289_v55  ;;  %1040 = vmatprep.subr.bf16.mxu1 %v1289_v55  ;;  %v777_v22 = vmul.f32 %v672_v50, %v672_v50  ;;  %v539_v33 = vld [vmem:[#allocation2 + $0x57] sm:$0xff]  ;;  %v540_v37 = vld [vmem:[#allocation2 + $0x5f] sm:$0xff] }
  0x43   : > { %v776_v5 = vmul.f32 %v671_v45, %v671_v45  ;;  %v752_v17 = vadd.f32 %v672_v50, %v671_v45  ;;  %v778_v25 = vmul.f32 %v673_v62, %v673_v62  ;;  %v624_v27 = vadd.f32 %v1339_v9, %v556_v53 }
  0x44   : > { %v779_v26 = vmul.f32 %v674_v15, %v674_v15  ;;  %v675_v29 = vadd.f32 %v659_v57, %v623_v3  ;;  %v557_v6 = vmul.f32 %v1304_v61, %v537_v16  ;;  %v660_v31 = vmul.f32 %v1307_v63, %v640_v4  ;;  %v643_v57 = vld [vmem:[#allocation2 + $0x59] sm:$0xff]  ;;  %v542_v16 = vld [vmem:[#allocation2 + $0x6f] sm:$0xff] }
  0x45   : > { %v792_v54 = vadd.f32 %v777_v22, %v776_v5  ;;  %v753_v30 = vadd.f32 %v752_v17, %v673_v62  ;;  %1026 = vmatpush3.bf16.msra.mxu0 %v1289_v55  ;;  %1048 = vmatpush3.bf16.msra.mxu1 %v1289_v55  ;;  %v558_v35 = vmul.f32 %v1304_v61, %v538_v23  ;;  %v541_v62 = vld [vmem:[#allocation2 + $0x67] sm:$0xff] }
  0x46   : > { %v780_v34 = vmul.f32 %v675_v29, %v675_v29  ;;  %v661_v36 = vmul.f32 %v1307_v63, %v641_v24  ;;  %1028 = vmatprep.subr.bf16.mxu0 %v1291_v56  ;;  %1041 = vmatprep.subr.bf16.mxu1 %v1291_v56  ;;  %v625_v39 = vadd.f32 %v1343_v10, %v557_v6  ;;  %v645_v22 = vld [vmem:[#allocation2 + $0x69] sm:$0xff] }
  0x47   : > { %v793_v9 = vadd.f32 %v792_v54, %v778_v25  ;;  %v754_v38 = vadd.f32 %v753_v30, %v674_v15  ;;  %v676_v40 = vadd.f32 %v660_v31, %v624_v27  ;;  %v626_v41 = vadd.f32 %v1347_v11, %v558_v35  ;;  %v644_v11 = vld [vmem:[#allocation2 + $0x61] sm:$0xff]  ;;  %v543_v54 = vld [vmem:[#allocation2 + $0x77] sm:$0xff] }
  0x48   : > { %v662_v42 = vmul.f32 %v1307_v63, %v642_v32  ;;  %v559_v55 = vmul.f32 %v1304_v61, %v539_v33  ;;  %v677_v50 = vadd.f32 %v661_v36, %v625_v39  ;;  %v560_v53 = vmul.f32 %v1304_v61, %v540_v37  ;;  %v646_v30 = vld [vmem:[#allocation2 + $0x71] sm:$0xff]  ;;  %v544_v39 = vld [vmem:[#allocation2 + $0x7f] sm:$0xff] }
  0x49   : > { %v794_v43 = vadd.f32 %v793_v9, %v779_v26  ;;  %v755_v45 = vadd.f32 %v754_v38, %v675_v29  ;;  %1030 = vmatpush3.bf16.msra.mxu0 %v1291_v56  ;;  %1049 = vmatpush3.bf16.msra.mxu1 %v1291_v56  ;;  %v781_v3 = vmul.f32 %v676_v40, %v676_v40 }
  0x4a   : > { %v678_v10 = vadd.f32 %v662_v42, %v626_v41  ;;  %v627_v15 = vadd.f32 %v1354_v12, %v559_v55  ;;  %1032 = vmatprep.subr.bf16.mxu0 %v1302_v60  ;;  %1042 = vmatprep.subr.bf16.mxu1 %v1302_v60  ;;  %v782_v17 = vmul.f32 %v677_v50, %v677_v50  ;;  %v545_v42 = vld [vmem:[#allocation2 + $0x87] sm:$0xff] }
  0x4b   : > { %v795_v4 = vadd.f32 %v794_v43, %v780_v34  ;;  %v756_v5 = vadd.f32 %v755_v45, %v676_v40  ;;  %v628_v24 = vadd.f32 %v1358_v13, %v560_v53  ;;  %v663_v25 = vmul.f32 %v1307_v63, %v643_v57  ;;  %v647_v40 = vld [vmem:[#allocation2 + $0x79] sm:$0xff]  ;;  %v648_v55 = vld [vmem:[#allocation2 + $0x81] sm:$0xff]  ;;  %v546_v43 = vld [vmem:[#allocation2 + $0x8f] sm:$0xff] }
  0x4c   : > { %v783_v23 = vmul.f32 %v678_v10, %v678_v10  ;;  %v561_v56 = vmul.f32 %v1304_v61, %v541_v62  ;;  %v664_v12 = vmul.f32 %v1307_v63, %v644_v11  ;;  %v562_v29 = vmul.f32 %v1304_v61, %v542_v16  ;;  %v650_v16 = vld [vmem:[#allocation2 + $0x91] sm:$0xff] }
  0x4d   : > { %v796_v26 = vadd.f32 %v795_v4, %v781_v3  ;;  %v757_v27 = vadd.f32 %v756_v5, %v677_v50  ;;  %1034 = vmatpush3.bf16.msra.mxu0 %v1302_v60  ;;  %1050 = vmatpush3.bf16.msra.mxu1 %v1302_v60  ;;  %v679_v6 = vadd.f32 %v663_v25, %v627_v15 }
  0x4e   : > { %v629_v31 = vadd.f32 %v1362_v14, %v561_v56  ;;  %v665_v13 = vmul.f32 %v1307_v63, %v645_v22  ;;  %v680_v34 = vadd.f32 %v664_v12, %v628_v24  ;;  %v630_v35 = vadd.f32 %v1366_v18, %v562_v29 }
  0x4f   : > { %v758_v32 = vadd.f32 %v757_v27, %v678_v10  ;;  %v797_v33 = vadd.f32 %v796_v26, %v782_v17  ;;  %v784_v36 = vmul.f32 %v679_v6, %v679_v6  ;;  %v563_v9 = vmul.f32 %v1304_v61, %v543_v54 }
  0x50   : > { %v681_v37 = vadd.f32 %v665_v13, %v629_v31  ;;  %v666_v38 = vmul.f32 %v1307_v63, %v646_v30  ;;  %980 = vmatmul.mubr.f32.vlgmr.msra.gmra.mrb[0].mxu0 %v1259_v44  ;;  %992 = vmatmul.mubr.f32.vlgmr.msra.gmra.mrb[0].mxu1 %v1297_v58  ;;  %v785_v41 = vmul.f32 %v680_v34, %v680_v34 }
  0x51   : > { %v798_v60 = vadd.f32 %v797_v33, %v783_v23  ;;  %v759_v14 = vadd.f32 %v758_v32, %v679_v6  ;;  %982 = vmatprep.mubr.f32.mxu0 %v1262_v46  ;;  %994 = vmatprep.mubr.f32.mxu1 %v1300_v59  ;;  %v631_v45 = vadd.f32 %v1370_v19, %v563_v9  ;;  %v649_v46 = vld [vmem:[#allocation2 + $0x89] sm:$0xff] }
  0x52   : > { %v786_v18 = vmul.f32 %v681_v37, %v681_v37  ;;  %v682_v50 = vadd.f32 %v666_v38, %v630_v35  ;;  %v564_v44 = vmul.f32 %v1304_v61, %v544_v39  ;;  %v667_v62 = vmul.f32 %v1307_v63, %v647_v40  ;;  %v775_v35 = vld [vmem:[%s1526_s5 + $0x3] sm:$0x1] }
  0x53   : > { %v799_v53 = vadd.f32 %v798_v60, %v784_v36  ;;  %v760_v57 = vadd.f32 %v759_v14, %v680_v34  ;;  %v565_v3 = vmul.f32 %v1304_v61, %v545_v42  ;;  %v668_v10 = vmul.f32 %v1307_v63, %v648_v55 }
  0x54   : > { %v787_v58 = vmul.f32 %v682_v50, %v682_v50  ;;  %v566_v15 = vmul.f32 %v1304_v61, %v546_v43  ;;  %983 = vmatmul.mubr.f32.gmra.mrb[2].mxu0 %v1267_v47  ;;  %995 = vmatmul.mubr.f32.gmra.mrb[2].mxu1 %v1312_v0  ;;  %v632_v11 = vadd.f32 %v1374_v20, %v564_v44 }
  0x55   : > { %v800_v59 = vadd.f32 %v799_v53, %v785_v41  ;;  %v761_v19 = vadd.f32 %v760_v57, %v681_v37  ;;  %985 = vmatprep.mubr.f32.mxu0 %v1270_v48  ;;  %997 = vmatprep.mubr.f32.mxu1 %v1315_v1  ;;  %v683_v4 = vadd.f32 %v667_v62, %v631_v45 }
  0x56   : > { %v633_v5 = vadd.f32 %v1378_v21, %v565_v3  ;;  %v634_v17 = vadd.f32 %v1385_v28, %v566_v15  ;;  %v684_v23 = vadd.f32 %v668_v10, %v632_v11  ;;  %v669_v47 = vmul.f32 %v1307_v63, %v649_v46 }
  0x57   : > { %v801_v61 = vadd.f32 %v800_v59, %v786_v18  ;;  %v762_v22 = vadd.f32 %v761_v19, %v682_v50  ;;  %v788_v24 = vmul.f32 %v683_v4, %v683_v4  ;;  %v670_v0 = vmul.f32 %v1307_v63, %v650_v16 }
  0x58   : > { %986 = vmatmul.mubr.f32.gmra.mrb[4].mxu0 %v1273_v49  ;;  %998 = vmatmul.mubr.f32.gmra.mrb[4].mxu1 %v1318_v2  ;;  %v789_v1 = vmul.f32 %v684_v23, %v684_v23  ;;  %v685_v21 = vadd.f32 %v669_v47, %v633_v5 }
  0x59   : > { %v802_v20 = vadd.f32 %v801_v61, %v787_v58  ;;  %v763_v48 = vadd.f32 %v762_v22, %v683_v4  ;;  %988 = vmatprep.mubr.f32.mxu0 %v1281_v51  ;;  %1000 = vmatprep.mubr.f32.mxu1 %v1332_v7  ;;  %v686_v28 = vadd.f32 %v670_v0, %v634_v17 }
  0x5a   : > { %v790_v26 = vmul.f32 %v685_v21, %v685_v21 }
  0x5b   : > { %v803_v25 = vadd.f32 %v802_v20, %v788_v24  ;;  %v764_v56 = vadd.f32 %v763_v48, %v684_v23  ;;  %v791_v63 = vmul.f32 %v686_v28, %v686_v28 }
  0x5c   : > { %989 = vmatmul.mubr.f32.gmra.mrb[6].mxu0 %v1284_v52  ;;  %1001 = vmatmul.mubr.f32.gmra.mrb[6].mxu1 %v1335_v8  ;;  %v751_v52 = vld [vmem:[%s1526_s5 + $0x2] sm:$0x1] }
  0x5d   : > { %v804_v27 = vadd.f32 %v803_v25, %v789_v1  ;;  %v765_v49 = vadd.f32 %v764_v56, %v685_v21 }
  0x5f   : > { %v766_v12 = vadd.f32 %v765_v49, %v686_v28  ;;  %v805_v2 = vadd.f32 %v804_v27, %v790_v26 }
  0x61   : > { %v767_v29 = vrot.slane %v766_v12, 4  ;;  %v806_v54 = vadd.f32 %v805_v2, %v791_v63 }
  0x63   : > { %v768_v30 = vadd.f32 %v767_v29, %v766_v12  ;;  %v807_v51 = vrot.slane %v806_v54, 4 }
  0x65   : > { %v769_v6 = vrot.slane %v768_v30, 2  ;;  %v808_v7 = vadd.f32 %v807_v51, %v806_v54 }
  0x67   : > { %v770_v31 = vadd.f32 %v769_v6, %v768_v30  ;;  %v809_v13 = vrot.slane %v808_v7, 2 }
  0x69   : > { %v771_v32 = vrot.slane %v770_v31, 1  ;;  %v810_v33 = vadd.f32 %v809_v13, %v808_v7 }
  0x6b   : > { %v772_v34 = vadd.f32 %v771_v32, %v770_v31  ;;  %v811_v8 = vrot.slane %v810_v33, 1 }
  0x6d   : > { %v773_v36 = vadd.f32 %v772_v34, %v751_v52  ;;  %v812_v37 = vadd.f32 %v811_v8, %v810_v33 }
  0x6f   : > { %774 = vst [vmem:[%s1526_s5 + $0x2] sm:$0x1] %v773_v36  ;;  %v813_v9 = vadd.f32 %v812_v37, %v775_v35 }
  0x71   : > { %814 = vst [vmem:[%s1526_s5 + $0x3] sm:$0x1] %v813_v9 }
 0x123   : > { %v981_v38 = vpop.f32.mrb[0].mxu0  ;;  %v993_v39 = vpop.f32.mrb[0].mxu1 }
 0x124   : > { %v713_v40 = vmul.f32 %v981_v38, %v981_v38  ;;  %v429_v60 = vpop.f32.mrb[1].mxu0  ;;  %v469_v14 = vpop.f32.mrb[1].mxu1  ;;  %v721_v56 = vmul.f32 %v993_v39, %v993_v39 }
 0x125   : > { %v688_v41 = vadd.f32 %v981_v38, %v429_v60  ;;  %v712_v42 = vmul.f32 %v429_v60, %v429_v60  ;;  %v720_v21 = vmul.f32 %v469_v14, %v469_v14 }
 0x127   : > { %v728_v55 = vadd.f32 %v713_v40, %v712_v42  ;;  %v984_v43 = vpop.f32.mrb[2].mxu0  ;;  %v996_v18 = vpop.f32.mrb[2].mxu1 }
 0x128   : > { %v439_v45 = vpop.f32.mrb[3].mxu0  ;;  %v479_v50 = vpop.f32.mrb[3].mxu1  ;;  %v715_v44 = vmul.f32 %v984_v43, %v984_v43  ;;  %v723_v2 = vmul.f32 %v996_v18, %v996_v18 }
 0x129   : > { %v689_v53 = vadd.f32 %v688_v41, %v439_v45  ;;  %v714_v57 = vmul.f32 %v439_v45, %v439_v45  ;;  %v722_v49 = vmul.f32 %v479_v50, %v479_v50  ;;  %v711_v45 = vld [vmem:[%s1526_s5 + $0x1] sm:$0x1] }
 0x12b   : > { %v729_v62 = vadd.f32 %v728_v55, %v714_v57  ;;  %v987_v58 = vpop.f32.mrb[4].mxu0  ;;  %v690_v3 = vadd.f32 %v984_v43, %v689_v53  ;;  %v999_v10 = vpop.f32.mrb[4].mxu1  ;;  %v687_v55 = vld [vmem:[%s1526_s5] sm:$0x1] }
 0x12c   : > { %v449_v15 = vpop.f32.mrb[5].mxu0  ;;  %v489_v46 = vpop.f32.mrb[5].mxu1  ;;  %v717_v16 = vmul.f32 %v987_v58, %v987_v58  ;;  %v725_v7 = vmul.f32 %v999_v10, %v999_v10 }
 0x12d   : > { %v691_v59 = vadd.f32 %v690_v3, %v449_v15  ;;  %v716_v19 = vmul.f32 %v449_v15, %v449_v15  ;;  %v730_v11 = vadd.f32 %v729_v62, %v715_v44  ;;  %v724_v30 = vmul.f32 %v489_v46, %v489_v46 }
 0x12f   : > { %v731_v4 = vadd.f32 %v730_v11, %v716_v19  ;;  %v990_v5 = vpop.f32.mrb[6].mxu0  ;;  %v692_v17 = vadd.f32 %v987_v58, %v691_v59  ;;  %v1002_v61 = vpop.f32.mrb[6].mxu1  ;;  %v826_v59 = vld [vmem:[%s1525_s4] sm:$0x1] (!%p910_p10)  ;;  %v828_v19 = vld [vmem:[%s1525_s4 + $0x2] sm:$0x1] (!%p910_p10) }
 0x130   : > { %v459_v22 = vpop.f32.mrb[7].mxu0  ;;  %v499_v23 = vpop.f32.mrb[7].mxu1  ;;  %v719_v20 = vmul.f32 %v990_v5, %v990_v5  ;;  %v727_v34 = vmul.f32 %v1002_v61, %v1002_v61 }
 0x131   : > { %v693_v47 = vadd.f32 %v692_v17, %v459_v22  ;;  %v718_v24 = vmul.f32 %v459_v22, %v459_v22  ;;  %v732_v0 = vadd.f32 %v731_v4, %v717_v16  ;;  %v726_v32 = vmul.f32 %v499_v23, %v499_v23  ;;  %v827_v17 = vld [vmem:[%s1525_s4 + $0x1] sm:$0x1] (!%p910_p10) }
 0x133   : > { %v694_v48 = vadd.f32 %v990_v5, %v693_v47  ;;  %v733_v1 = vadd.f32 %v732_v0, %v718_v24  ;;  %v829_v24 = vld [vmem:[%s1525_s4 + $0x3] sm:$0x1] (!%p910_p10) }
 0x135   : > { %v734_v28 = vadd.f32 %v733_v1, %v719_v20  ;;  %v695_v25 = vadd.f32 %v694_v48, %v469_v14 }
 0x137   : > { %v735_v26 = vadd.f32 %v734_v28, %v720_v21  ;;  %v696_v27 = vadd.f32 %v993_v39, %v695_v25 }
 0x139   : > { %v697_v63 = vadd.f32 %v696_v27, %v479_v50  ;;  %v736_v12 = vadd.f32 %v735_v26, %v721_v56 }
 0x13b   : > { %v737_v29 = vadd.f32 %v736_v12, %v722_v49  ;;  %v698_v54 = vadd.f32 %v996_v18, %v697_v63 }
 0x13d   : > { %v699_v51 = vadd.f32 %v698_v54, %v489_v46  ;;  %v738_v6 = vadd.f32 %v737_v29, %v723_v2 }
 0x13f   : > { %v739_v31 = vadd.f32 %v738_v6, %v724_v30  ;;  %v700_v13 = vadd.f32 %v999_v10, %v699_v51 }
 0x141   : > { %v701_v33 = vadd.f32 %v700_v13, %v499_v23  ;;  %v740_v52 = vadd.f32 %v739_v31, %v725_v7 }
 0x143   : > { %v702_v8 = vadd.f32 %v1002_v61, %v701_v33  ;;  %v741_v35 = vadd.f32 %v740_v52, %v726_v32 }
 0x145   : > { %v703_v36 = vrot.slane %v702_v8, 4  ;;  %v742_v37 = vadd.f32 %v741_v35, %v727_v34 }
 0x147   : > { %v704_v9 = vadd.f32 %v703_v36, %v702_v8  ;;  %v743_v38 = vrot.slane %v742_v37, 4 }
 0x149   : > { %v705_v39 = vrot.slane %v704_v9, 2  ;;  %v744_v40 = vadd.f32 %v743_v38, %v742_v37 }
 0x14b   : > { %v706_v60 = vadd.f32 %v705_v39, %v704_v9  ;;  %v745_v14 = vrot.slane %v744_v40, 2 }
 0x14d   : > { %v707_v41 = vrot.slane %v706_v60, 1  ;;  %v746_v42 = vadd.f32 %v745_v14, %v744_v40 }
 0x14f   : > { %v708_v43 = vadd.f32 %v707_v41, %v706_v60  ;;  %v747_v18 = vrot.slane %v746_v42, 1  ;;  %818 = sbr.rel (%p910_p10) target bundleno = 383 (0x17f), region = 86 }
 0x151   : > { %v709_v50 = vadd.f32 %v708_v43, %v687_v55  ;;  %v748_v53 = vadd.f32 %v747_v18, %v746_v42 }
 0x153   : > { %710 = vst [vmem:[%s1526_s5] sm:$0x1] %v709_v50  ;;  %v749_v57 = vadd.f32 %v748_v53, %v711_v45 }
 0x155   : > { %750 = vst [vmem:[%s1526_s5 + $0x1] sm:$0x1] %v749_v57 }
 0x15c   : > { %v819_v44 = vld [vmem:[%s1526_s5] sm:$0xf] }
 0x15d   : > { %v820_v62 = vmul.f32 0.001953125, %v819_v44 }
 0x15f   : > { %v821_v58 = vmul.f32 %v820_v62, %v820_v62 }
 0x161   : > { %v823_v3 = vrot.slane %v821_v58, 7 }
 0x163   : > { %v825_v10 = vsub.f32 %v820_v62, %v823_v3 }
 0x165   : > { %v830_v15 = vadd.f32 1e-05, %v825_v10 }
 0x167   : > { %1076 = vrsqrt.f32 %v830_v15 }
 0x171   : > { %v1077_v46 = vpop.eup %1076 }
 0x172   : > { %v833_v11 = vrot.slane %v1077_v46, 1  ;;  %v836_v16 = vrot.slane %v1077_v46, 3 }
 0x174   : > { %v835_v4 = vmul.f32 %v833_v11, %v826_v59  ;;  %v838_v5 = vmul.f32 %v836_v16, %v828_v19 }
 0x176   : > { %839 = vst [vmem:[%s1526_s5] sm:$0x1] %v835_v4  ;;  %v840_v61 = vmul.f32 %v835_v4, %v820_v62  ;;  %843 = vst [vmem:[%s1526_s5 + $0x2] sm:$0x1] %v838_v5  ;;  %v845_v22 = vrot.slane %v838_v5, 6 }
 0x178   : > { %v841_v23 = vsub.f32 %v827_v17, %v840_v61  ;;  %v847_v47 = vmul.f32 %v845_v22, %v820_v62 }
 0x17a   : > { %842 = vst [vmem:[%s1526_s5 + $0x1] sm:$0x1] %v841_v23  ;;  %v849_v0 = vrot.slane %v847_v47, 2 }
 0x17c   : > { %v851_v20 = vsub.f32 %v829_v24, %v849_v0 }
 0x17e   : > { %852 = vst [vmem:[%s1526_s5 + $0x3] sm:$0x1] %v851_v20 }
 0x17f PF: > { %p12_p11 = scmp.ge.s32.totalorder %s1152_s22, 6   ;;  %s1527_s18 = smov %s1096_s19 }
 0x180   : > { %s1528_s19 = smov %s1161_s25  ;;  %s1529_s20 = smov %s1152_s22 }
 0x181   :  { %14 = sbr.rel (!%p12_p11) target bundleno = 2 (0x2), region = 120 }

</bundles_post_ra>
